<compile_context>
chip_gen: v5e
topology: v5e:2x2
jax: 0.10.0
libtpu: 0.0.40
codegen_flags: <defaults>
</compile_context>

<pallas_src>
import jax
import jax.numpy as jnp
from jax.experimental import pallas as pl
from jax.experimental.pallas import tpu as pltpu


def _decode_kernel(p_ref, gy_ref, addx_ref, sely_ref, iswh_ref, mul_ref, o_ref):
    x = p_ref[...].astype(jnp.float32)                  # (R, L)

    # (1, L) -> (R, L) broadcast of the w/h-channel selector.
    wh_mask = jnp.broadcast_to(iswh_ref[...], x.shape) > 0.5

    # Single exp per element: exp(x) on w/h lanes, exp(-|x|) elsewhere.
    t = jnp.exp(jnp.where(wh_mask, x, -jnp.abs(x)))
    inv = 1.0 / (1.0 + t)
    sig = jnp.where(x >= 0, inv, t * inv)               # stable sigmoid(x)
    val = jnp.where(wh_mask, t, sig)                    # exp on w/h, sigmoid else

    # Grid offsets: channel 0 adds gx (per-lane table), channel 1 adds gy
    # (per-row column times a per-lane selector).
    add = addx_ref[...] + gy_ref[...] * sely_ref[...]   # (R, L) via broadcast

    # Scale: stride for x/y, anchor*stride for w/h, 1 for conf/prob.
    o_ref[...] = (val + add) * mul_ref[...]


def _pick_tile_rows(rows, row_bytes, target_bytes=2 * 1024 * 1024):
    """Rows per block: ~2 MiB blocks, sublane-aligned, and >=2 grid steps."""
    if rows <= 8:
        return rows
    tr = min(rows, max(1, target_bytes // row_bytes))
    if tr * 2 > rows:                     # keep >= 2 grid steps (v7x has 2 TCs)
        tr = pl.cdiv(rows, 2)
    if tr < rows:
        tr = max(8, (tr // 8) * 8)        # multiple of 8 unless full extent
    return min(tr, rows)


def yolo_head_forward(p, nC, anchors, stride):
    """Returns (p_permuted, pred_bbox) like Yolo_head.forward in training mode."""
    bs = p.shape[0]
    nG = p.shape[-1]
    anchors = jnp.asarray(anchors, jnp.float32)
    nA = anchors.shape[0]
    C = 5 + nC
    assert p.shape[1] == nA * C

    # Same view + permute as the PyTorch module (p5 is a required output).
    p5 = p.reshape(bs, nA, C, nG, nG).transpose(0, 3, 4, 1, 2)  # (bs,gy,gx,nA,C)

    # Free reshape to the lane-dense slab: rows=(b,gy), lanes=(gx,a,c).
    L = nG * nA * C
    rows = bs * nG
    p2d = p5.reshape(rows, L)

    stride_f = jnp.float32(stride)

    # Tiny per-lane constant tables (computed once by XLA; negligible traffic).
    lane = jnp.arange(L, dtype=jnp.int32)
    c = lane % C
    a = (lane // C) % nA
    gx = lane // (C * nA)
    addx = jnp.where(c == 0, gx, 0).astype(jnp.float32)[None, :]      # +gx on ch0
    sely = (c == 1).astype(jnp.float32)[None, :]                      # +gy on ch1
    iswh = ((c == 2) | (c == 3)).astype(jnp.float32)[None, :]         # exp lanes
    aw = anchors[:, 0][a]
    ah = anchors[:, 1][a]
    mul = jnp.where(c < 2, stride_f,
          jnp.where(c == 2, aw * stride_f,
          jnp.where(c == 3, ah * stride_f, jnp.float32(1.0))))[None, :]
    gy_col = (jnp.arange(rows, dtype=jnp.int32) % nG).astype(jnp.float32)[:, None]

    tile_rows = _pick_tile_rows(rows, L * 4)
    grid = (pl.cdiv(rows, tile_rows),)

    row_spec = pl.BlockSpec((tile_rows, L), lambda i: (i, 0))
    col_spec = pl.BlockSpec((tile_rows, 1), lambda i: (i, 0))
    vec_spec = pl.BlockSpec((1, L), lambda i: (0, 0))

    pred2d = pl.pallas_call(
        _decode_kernel,
        out_shape=jax.ShapeDtypeStruct((rows, L), jnp.float32),
        grid=grid,
        in_specs=[row_spec, col_spec, vec_spec, vec_spec, vec_spec, vec_spec],
        out_specs=row_spec,
        compiler_params=pltpu.CompilerParams(
            dimension_semantics=("parallel",)),
    )(p2d, gy_col, addx, sely, iswh, mul)

    p_de = pred2d.reshape(bs, nG, nG, nA, C)
    # TODO(synk): eval-mode variant would return pred2d.reshape(-1, 5 + nC).
    return p5, p_de


def _reference_forward(p, nC, anchors, stride):
    """Pure-jnp reference mirroring the PyTorch code."""
    bs = p.shape[0]
    nG = p.shape[-1]
    nA = anchors.shape[0]
    C = 5 + nC
    p5 = p.reshape(bs, nA, C, nG, nG).transpose(0, 3, 4, 1, 2)
    dxdy = p5[..., 0:2]
    dwdh = p5[..., 2:4]
    conf = p5[..., 4:5]
    prob = p5[..., 5:]
    gy, gx = jnp.meshgrid(jnp.arange(nG), jnp.arange(nG), indexing="ij")
    grid_xy = jnp.stack([gx, gy], axis=-1).astype(jnp.float32)
    grid_xy = grid_xy[None, :, :, None, :]  # (1,nG,nG,1,2)
    pred_xy = (jax.nn.sigmoid(dxdy) + grid_xy) * stride
    pred_wh = jnp.exp(dwdh) * anchors * stride
    pred_conf = jax.nn.sigmoid(conf)
    pred_prob = jax.nn.sigmoid(prob)
    return p5, jnp.concatenate([pred_xy, pred_wh, pred_conf, pred_prob], axis=-1)


if __name__ == "__main__":
    # Module config: 3 anchors, nC classes, stride.
    nC = 20
    stride = 8.0
    anchors = jnp.array([[1.25, 1.625], [2.0, 3.75], [4.125, 2.875]],
                        dtype=jnp.float32)
    nA = anchors.shape[0]

    bs, nG = 2, 16
    key = jax.random.PRNGKey(0)
    # NCHW conv-head output: (bs, nA*(5+nC), nG, nG)
    p = jax.random.normal(key, (bs, nA * (5 + nC), nG, nG), dtype=jnp.float32)

    p_perm, p_de = yolo_head_forward(p, nC, anchors, stride)
    jax.block_until_ready(p_de)

    p_perm_ref, p_de_ref = _reference_forward(p, nC, anchors, stride)
    assert p_perm.shape == (bs, nG, nG, nA, 5 + nC)
    assert p_de.shape == (bs, nG, nG, nA, 5 + nC)
    assert jnp.allclose(p_perm, p_perm_ref, atol=1e-5, rtol=1e-5)
    assert jnp.allclose(p_de, p_de_ref, atol=1e-4, rtol=1e-4)

    print("KERNEL_OK")
</pallas_src>

<mosaic_0001>
module attributes {stable_mosaic.version = 11 : i64} {
  func.func @_decode_kernel(%arg0: i32, %arg1: memref<16x1200xf32, #tpu.memory_space<vmem>>, %arg2: memref<16x1xf32, #tpu.memory_space<vmem>>, %arg3: memref<1x1200xf32, #tpu.memory_space<vmem>>, %arg4: memref<1x1200xf32, #tpu.memory_space<vmem>>, %arg5: memref<1x1200xf32, #tpu.memory_space<vmem>>, %arg6: memref<1x1200xf32, #tpu.memory_space<vmem>>, %arg7: memref<16x1200xf32, #tpu.memory_space<vmem>>) attributes {dimension_semantics = [#tpu.dimension_semantics<parallel>], iteration_bounds = array<i64: 2>, scalar_prefetch = 0 : i64, scratch_operands = 0 : i64, tpu.core_type = #tpu.core_type<tc>, window_params = [{transform_indices = @transform_0, window_bounds = array<i64: 16, 1200>}, {transform_indices = @transform_1, window_bounds = array<i64: 16, 1>}, {pipeline_mode = #tpu.pipeline_mode<synchronous>, transform_indices = @transform_2, window_bounds = array<i64: 1, 1200>}, {pipeline_mode = #tpu.pipeline_mode<synchronous>, transform_indices = @transform_3, window_bounds = array<i64: 1, 1200>}, {pipeline_mode = #tpu.pipeline_mode<synchronous>, transform_indices = @transform_4, window_bounds = array<i64: 1, 1200>}, {pipeline_mode = #tpu.pipeline_mode<synchronous>, transform_indices = @transform_5, window_bounds = array<i64: 1, 1200>}, {transform_indices = @transform_6, window_bounds = array<i64: 16, 1200>}]} {
    %c0 = arith.constant 0 : index
    %c0_0 = arith.constant 0 : index
    %0 = vector.load %arg1[%c0, %c0_0] : memref<16x1200xf32, #tpu.memory_space<vmem>>, vector<16x1200xf32>
    %c0_1 = arith.constant 0 : index
    %c0_2 = arith.constant 0 : index
    %1 = vector.load %arg5[%c0_1, %c0_2] : memref<1x1200xf32, #tpu.memory_space<vmem>>, vector<1x1200xf32>
    %2 = vector.shape_cast %1 : vector<1x1200xf32> to vector<1x1200xf32>
    %3 = vector.broadcast %2 : vector<1x1200xf32> to vector<16x1200xf32>
    %cst = arith.constant 5.000000e-01 : f32
    %4 = vector.broadcast %cst : f32 to vector<16x1200xf32>
    %5 = arith.cmpf ogt, %3, %4 : vector<16x1200xf32>
    %6 = math.absf %0 : vector<16x1200xf32>
    %cst_3 = arith.constant 0.000000e+00 : f32
    %7 = vector.broadcast %cst_3 : f32 to vector<16x1200xf32>
    %8 = arith.subf %7, %6 : vector<16x1200xf32>
    %9 = arith.select %5, %0, %8 : vector<16x1200xi1>, vector<16x1200xf32>
    %10 = math.exp %9 : vector<16x1200xf32>
    %cst_4 = arith.constant 1.000000e+00 : f32
    %11 = vector.broadcast %cst_4 : f32 to vector<16x1200xf32>
    %12 = arith.addf %11, %10 : vector<16x1200xf32>
    %cst_5 = arith.constant 1.000000e+00 : f32
    %13 = vector.broadcast %cst_5 : f32 to vector<16x1200xf32>
    %14 = arith.divf %13, %12 : vector<16x1200xf32>
    %cst_6 = arith.constant 0.000000e+00 : f32
    %15 = vector.broadcast %cst_6 : f32 to vector<16x1200xf32>
    %16 = arith.cmpf oge, %0, %15 : vector<16x1200xf32>
    %17 = arith.mulf %10, %14 : vector<16x1200xf32>
    %18 = arith.select %16, %14, %17 : vector<16x1200xi1>, vector<16x1200xf32>
    %19 = arith.select %5, %10, %18 : vector<16x1200xi1>, vector<16x1200xf32>
    %c0_7 = arith.constant 0 : index
    %c0_8 = arith.constant 0 : index
    %20 = vector.load %arg3[%c0_7, %c0_8] : memref<1x1200xf32, #tpu.memory_space<vmem>>, vector<1x1200xf32>
    %c0_9 = arith.constant 0 : index
    %c0_10 = arith.constant 0 : index
    %21 = vector.load %arg2[%c0_9, %c0_10] : memref<16x1xf32, #tpu.memory_space<vmem>>, vector<16x1xf32>
    %c0_11 = arith.constant 0 : index
    %c0_12 = arith.constant 0 : index
    %22 = vector.load %arg4[%c0_11, %c0_12] : memref<1x1200xf32, #tpu.memory_space<vmem>>, vector<1x1200xf32>
    %23 = vector.broadcast %21 : vector<16x1xf32> to vector<16x1200xf32>
    %24 = vector.broadcast %22 : vector<1x1200xf32> to vector<16x1200xf32>
    %25 = arith.mulf %23, %24 : vector<16x1200xf32>
    %26 = vector.broadcast %20 : vector<1x1200xf32> to vector<16x1200xf32>
    %27 = arith.addf %26, %25 : vector<16x1200xf32>
    %28 = arith.addf %19, %27 : vector<16x1200xf32>
    %c0_13 = arith.constant 0 : index
    %c0_14 = arith.constant 0 : index
    %29 = vector.load %arg6[%c0_13, %c0_14] : memref<1x1200xf32, #tpu.memory_space<vmem>>, vector<1x1200xf32>
    %30 = vector.broadcast %29 : vector<1x1200xf32> to vector<16x1200xf32>
    %31 = arith.mulf %28, %30 : vector<16x1200xf32>
    %c0_15 = arith.constant 0 : index
    %c0_16 = arith.constant 0 : index
    %32 = vector.load %arg7[%c0_15, %c0_16] : memref<16x1200xf32, #tpu.memory_space<vmem>>, vector<16x1200xf32>
    tpu.vector_store %arg7[%c0_15, %c0_16], %31 {strides = array<i32>} : memref<16x1200xf32, #tpu.memory_space<vmem>>, vector<16x1200xf32>,
    return
  }
  func.func @transform_0(%arg0: i32) -> (i32, i32) {
    %c0_i32 = arith.constant 0 : i32
    %c0_i32_0 = arith.constant 0 : i32
    return %arg0, %c0_i32 : i32, i32
  }
  func.func @transform_1(%arg0: i32) -> (i32, i32) {
    %c0_i32 = arith.constant 0 : i32
    %c0_i32_0 = arith.constant 0 : i32
    return %arg0, %c0_i32 : i32, i32
  }
  func.func @transform_2(%arg0: i32) -> (i32, i32) {
    %c0_i32 = arith.constant 0 : i32
    %c0_i32_0 = arith.constant 0 : i32
    %c0_i32_1 = arith.constant 0 : i32
    return %c0_i32, %c0_i32_0 : i32, i32
  }
  func.func @transform_3(%arg0: i32) -> (i32, i32) {
    %c0_i32 = arith.constant 0 : i32
    %c0_i32_0 = arith.constant 0 : i32
    %c0_i32_1 = arith.constant 0 : i32
    return %c0_i32, %c0_i32_0 : i32, i32
  }
  func.func @transform_4(%arg0: i32) -> (i32, i32) {
    %c0_i32 = arith.constant 0 : i32
    %c0_i32_0 = arith.constant 0 : i32
    %c0_i32_1 = arith.constant 0 : i32
    return %c0_i32, %c0_i32_0 : i32, i32
  }
  func.func @transform_5(%arg0: i32) -> (i32, i32) {
    %c0_i32 = arith.constant 0 : i32
    %c0_i32_0 = arith.constant 0 : i32
    %c0_i32_1 = arith.constant 0 : i32
    return %c0_i32, %c0_i32_0 : i32, i32
  }
  func.func @transform_6(%arg0: i32) -> (i32, i32) {
    %c0_i32 = arith.constant 0 : i32
    %c0_i32_0 = arith.constant 0 : i32
    return %arg0, %c0_i32 : i32, i32
  }
}

</mosaic_0001>

<bundles_post_ra>
// kernel: tpu_custom_call.1
= control target key start
LH: loop header
LB: loop body
LE: loop exit
PB: predicated region body
PF: predicated region fallthrough
CT: control target
= control target key end

     0   :  { %s2949_s0 = inlined_call_operand.hbm [shape: f32[32,1200], index: 0, kind: input, shape index: {}]   ;;  %s2950_s1 = inlined_call_operand.vmem [shape: f32[32,1], index: 1, kind: input, shape index: {}]   ;;  %s2951_s2 = inlined_call_operand.vmem [shape: f32[1,1200], index: 2, kind: input, shape index: {}]   ;;  %s2952_s3 = inlined_call_operand.vmem [shape: f32[1,1200], index: 3, kind: input, shape index: {}]   ;;  %s2953_s4 = inlined_call_operand.vmem [shape: f32[1,1200], index: 4, kind: input, shape index: {}]   ;;  %s2954_s5 = inlined_call_operand.hbm [shape: f32[1,1200], index: 5, kind: input, shape index: {}]   ;;  %s2955_s6 = inlined_call_operand.hbm [shape: f32[32,1200], index: 6, kind: output, shape index: {}]  }
   0x1   :  { %3076 = sst [smem:[#allocation57_spill]] %s2954_s5 }
   0x2   :  { %11 = vsyncpa [#allocation3], 0 }
   0x3   :  { %13 = vsyncpa [#allocation3 + $0x1], 0 }
   0x4   :  { %14 = vsyncpa [#allocation6], 0 }
   0x5   :  { %15 = vsyncpa [#allocation4], 0 }
   0x6   :  { %17 = vsyncpa [#allocation4 + $0x1], 0  ;;  %s1499_s21 = smov 0   ;;  %s1501_s22 = smov 0  }
   0x7   :  { %s1503_s23 = smov 0   ;;  %s1505_s24 = smov 0  }
   0x8 LB: > { %3077 = sst [smem:[#allocation11_spill]] %s1452_s23  ;;  %s1520_s25 = sadd.s32 4294967295, %s1456_s24   ;;  %s1456_s24 = sphi %s1505_s24, %s3397_s24   ;;  %s1452_s23 = sphi %s1503_s23, %s3394_s23   ;;  %s1448_s22 = sphi %s1501_s22, %s3396_s22   ;;  %s1444_s21 = sphi %s1499_s21, %s3395_s21  }
   0x9   : > { %s1163_s26 = sadd.s32 4294967294, %s1456_s24   ;;  %s1524_s27 = sadd.s32 1, %s1456_s24  }
   0xa   : > { %s30_s28 = sadd.s32 1, %s1452_s23  ;;  %s27_s29 = ssub.s32 %s1456_s24, %s1524_s27 }
   0xb   : > { %p37_p0 = scmp.ne.s32.totalorder %s1452_s23, %s1448_s22  ;;  %p28_p1 = scmp.eq.s32.totalorder %s27_s29, 0 }
   0xc   : > { %p38_p2 = scmp.eq.s32.totalorder %s1456_s24, 0  ;;  %p43_p3 = scmp.ne.s32.totalorder %s1448_s22, %s1444_s21 }
   0xd   : > { %p44_p4 = scmp.eq.s32.totalorder %s1520_s25, 0  ;;  %p177_p7 = scmp.eq.s32.totalorder %s1520_s25, 1 }
   0xe   : > { %s1536_s30 = scalar_select %p28_p1, %s1452_s23, %s30_s28  }
   0xf   : > { %p1538_p5 = por %p38_p2, %p37_p0  ;;  %p1544_p6 = por %p44_p4, %p43_p3 }
  0x10   : > { %3078 = sst [smem:[#allocation12_spill]] %s1536_s30  ;;  %p183_p8 = scmp.eq.s32.totalorder %s1163_s26, 1 }
  0x11   : > { %p1164_p9 = scmp.ge.s32.totalorder %s1456_s24, 1  ;;  %p190_p10 = scmp.lt.s32.totalorder %s1456_s24, 3 }
  0x12   : > { %p1551_p11 = por %p177_p7, %p37_p0  ;;  %p1555_p12 = por %p183_p8, %p43_p3 }
  0x13   : > { %p1559_p13 = pnand %p1164_p9, %p190_p10  ;;  %s3084_s5 = sld [smem:[#allocation57_spill]] }
  0x14   : > { %s1458_s15 = smov [#allocation5]   ;;  %p1204_p3 = scmp.lt.s32.totalorder %s1456_s24, 2 }
  0x15   : > { %p1191_p1 = pneg %p1559_p13  ;;  %s213_s16 = sshll.u32 %s1458_s15, 4  ;;  %s214_s16 = int_to_ptr.vmem [resolvable:$true] %s213_s16 }
  0x16   : > { %s224_s17 = sand.u32 1, %s1452_s23   ;;  %p1575_p7 = pnand %p1204_p3, %p1538_p5 }
  0x17   : > { %p1192_p2 = pnand %p1191_p1, %p44_p4  ;;  %s1179_s19 = smul.u32 160, %s224_s17 }
  0x18   : > { %s1180_s20 = smul.u32 160, %s1456_s24  ;;  %p1360_p8 = pneg %p1575_p7 }
  0x19   : > { %s211_s14 = sshll.u32 %s3084_s5, 4  ;;  %s228_s12 = scalar_lea.vmem [#allocation2], %s1179_s19  ;;  %s212_s14 = int_to_ptr.hbm [resolvable:$true] %s211_s14 }
  0x1a   : > { %1194 = dma.hbm_to_vmem [thread:$0]  (!%p1192_p2), %s212_s14, 160, %s214_s16, [#allocation6]  }
  0x1b   : > { %s234_s29 = scalar_lea.hbm %s2949_s0, %s1180_s20  ;;  %s237_s13 = sshll.u32 %s228_s12, 4  ;;  %s238_s13 = int_to_ptr.vmem [resolvable:$true] %s237_s13 }
  0x1c   : > { %s235_s15 = sshll.u32 %s234_s29, 4  ;;  %s225_s5 = scalar_lea.sflag [#allocation3], %s224_s17  ;;  %s236_s15 = int_to_ptr.hbm [resolvable:$true] %s235_s15 }
  0x1d   : > { %s1356_s30 = sshra.s32 %s236_s15, 4  ;;  %s1363_s23 = scalar_lea.hbm %s2949_s0, 320  ;;  %s1357_s30 = int_to_ptr.hbm [resolvable:$true] %s1356_s30 }
  0x1e   : > { %s1358_s7 = scalar_lea.hbm %s1357_s30, 160  ;;  %p1364_p1 = scmp.lt.s32.totalorder %s1357_s30, %s2949_s0 }
  0x1f   : > { %p1359_p5 = scmp.ne.s32.totalorder %s1357_s30, %s1358_s7  ;;  %p1365_p2 = scmp.lt.s32.totalorder %s1363_s23, %s1358_s7 }
  0x21   : > { %p1361_p9 = pnand %p1360_p8, %p1359_p5  ;;  %p1366_p3 = por %p1365_p2, %p1364_p1 }
  0x23   : > { %p1362_p10 = pneg %p1361_p9 }
  0x25   : > { %p1367_p0 = pnand %p1366_p3, %p1362_p10 }
  0x27   : > { %1370 = shalt.err (!%p1367_p0)
}
  0x28   : > { %s1459_s17 = smov 1280   ;;  %s1460_s19 = smov 80  }
  0x29   : > { %1198 = dma.hbm_to_vmem [thread:$0]  (!%p1575_p7), %s236_s15, 2560, %s238_s13, %s225_s5, %s1459_s17, %s1459_s17, %s1460_s19  }
  0x2a   : > { %258 = sbr.rel (%p1559_p13) target bundleno = 223 (0xdf), region = 44 }
  0x2f   : > { %s1596_s28 = sand.u32 1, %s1448_s22  }
  0x30   : > { %s1181_s30 = smul.u32 160, %s1596_s28  ;;  %s261_s23 = scalar_lea.sflag [#allocation3], %s1596_s28 }
  0x32   : > { %s1602_s29 = scalar_lea.vmem [#allocation2], %s1181_s30 }
  0x33   : > { %1431 = dma.done.wait (%p1544_p6), %s261_s23, 2560  }
  0x34   : > { %1433 = vsyncadd (%p1544_p6), %s261_s23, 4294964736 }
  0x35   : > { %1435 = dma.done.wait (%p44_p4), [#allocation6], 160  }
  0x36   : > { %1437 = vsyncadd (%p44_p4), [#allocation6], 4294967136  ;;  %s1172_s5 = sshll.u32 %s1520_s25, 1  ;;  %v1461_v0 = vmov 0   ;;  %v1617_v3 = vld [vmem:[%s1602_s29] sm:$0xff]  ;;  %v1623_v5 = vld [vmem:[%s1602_s29 + $0x8] sm:$0xff] }
  0x37   : > { %1245 = vset.pattern.permute.xlu0 %v1461_v0  ;;  %p306_p13 = scmp.lt.s32.totalorder %s1172_s5, 3  ;;  %v332_v4 = vld [vmem:[%s2953_s4] sm:$0xff]  ;;  %v1626_v6 = vld [vmem:[%s1602_s29 + $0x10] sm:$0xff]  ;;  %v1629_v7 = vld [vmem:[%s1602_s29 + $0x18] sm:$0xff]  ;;  %v366_v11 = vand.u32 2147483647, %v1617_v3 }
  0x38   : > { %v333_v8 = vld [vmem:[%s2953_s4 + $0x8] sm:$0x3]  ;;  %v336_v9 = vperm.slane %v332_v4, 0  ;;  %v337_v10 = vperm.slane %v332_v4, 1  ;;  %v1636_v12 = vld [vmem:[%s1602_s29 + $0x20] sm:$0xff]  ;;  %v338_v14 = vperm.slane %v332_v4, 2 }
  0x39   : > { %s3399_s5 = smov (!%p306_p13, %s1172_s5), 3  ;;  %v1639_v13 = vld [vmem:[%s1602_s29 + $0x28] sm:$0xff]  ;;  %v339_v15 = vperm.slane %v332_v4, 3  ;;  %v367_v16 = vand.u32 2147483647, %v1623_v5  ;;  %v1643_v17 = vld [vmem:[%s1602_s29 + $0x30] sm:$0xff] }
  0x3a   : > { %s1173_s11 = sshll.u32 %s3399_s5, 3  ;;  %3086 = vst [vmem:[#allocation13_spill] sm:$0xff] %v1643_v17  ;;  %v340_v18 = vperm.slane %v332_v4, 4  ;;  %v341_v19 = vperm.slane %v332_v4, 5  ;;  %v342_v20 = vperm.slane %v332_v4, 6  ;;  %v1647_v22 = vld [vmem:[%s1602_s29 + $0x38] sm:$0xff] }
  0x3b   : > { %s309_s12 = scalar_lea.vmem %s2950_s1, %s1173_s11  ;;  %v368_v21 = vand.u32 2147483647, %v1626_v6  ;;  %3087 = vst [vmem:[#allocation14_spill] sm:$0xff] %v1647_v22  ;;  %v343_v23 = vperm.slane %v332_v4, 7  ;;  %v344_v24 = vperm.slane %v333_v8, 0  ;;  %v345_v25 = vperm.slane %v333_v8, 1 }
  0x3c   : > { %v868_v1 = vld [vmem:[%s309_s12] sm:$0xff]  ;;  %v869_v2 = vld [vmem:[%s309_s12 + $0x8] sm:$0xff]  ;;  %v369_v26 = vand.u32 2147483647, %v1629_v7  ;;  %vm1653_vm0 = vcmp.gt.f32.partialorder %v336_v9, 0.5  ;;  %v3089_v28 = vmov 0 }
  0x3d   : > { %874 = vperm.xlu0 %1245, %v868_v1   ;;  %v1651_v27 = vld [vmem:[%s1602_s29 + $0x40] sm:$0xff]  ;;  %v3090_v28 = vsel %vm1653_vm0, 4294967295, %v3089_v28  ;;  %vm1657_vm1 = vcmp.gt.f32.partialorder %v337_v10, 0.5  ;;  %v3092_v29 = vmov 0  ;;  %v370_v30 = vand.u32 2147483647, %v1636_v12 }
  0x3e   : > { %3088 = vst [vmem:[#allocation15_spill] sm:$0xff] %v1651_v27  ;;  %v3093_v29 = vsel %vm1657_vm1, 4294967295, %v3092_v29  ;;  %v386_v31 = vsub.f32 0.0, %v366_v11  ;;  %v1663_v32 = vld [vmem:[%s1602_s29 + $0x48] sm:$0xff]  ;;  %vm1665_vm2 = vcmp.gt.f32.partialorder %v338_v14, 0.5  ;;  %v3096_v33 = vmov 0 }
  0x3f   : > { %3091 = vst [vmem:[#allocation16_spill] sm:$0xff] %v3090_v28  ;;  %v3097_v33 = vsel %vm1665_vm2, 4294967295, %v3096_v33  ;;  %vm1669_vm3 = vcmp.gt.f32.partialorder %v339_v15, 0.5  ;;  %v3099_v34 = vmov 0  ;;  %v371_v35 = vand.u32 2147483647, %v1639_v13 }
  0x40   : > { %3094 = vst [vmem:[#allocation17_spill] sm:$0xff] %v3093_v29  ;;  %v3100_v34 = vsel %vm1669_vm3, 4294967295, %v3099_v34  ;;  %v387_v36 = vsub.f32 0.0, %v367_v16  ;;  %v1675_v37 = vld [vmem:[%s1602_s29 + $0x50] sm:$0xff]  ;;  %vm1677_vm4 = vcmp.gt.f32.partialorder %v340_v18, 0.5  ;;  %v3103_v38 = vmov 0 }
  0x41   : > { %3095 = vst [vmem:[#allocation18_spill] sm:$0xff] %v1663_v32  ;;  %v3104_v38 = vsel %vm1677_vm4, 4294967295, %v3103_v38  ;;  %vm1681_vm5 = vcmp.gt.f32.partialorder %v341_v19, 0.5  ;;  %v3106_v39 = vmov 0  ;;  %v372_v40 = vand.u32 2147483647, %v1643_v17 }
  0x42   : > { %3098 = vst [vmem:[#allocation19_spill] sm:$0xff] %v3097_v33  ;;  %v3107_v39 = vsel %vm1681_vm5, 4294967295, %v3106_v39  ;;  %v388_v41 = vsub.f32 0.0, %v368_v21  ;;  %v1687_v42 = vld [vmem:[%s1602_s29 + $0x58] sm:$0xff]  ;;  %vm1689_vm6 = vcmp.gt.f32.partialorder %v342_v20, 0.5  ;;  %v3110_v43 = vmov 0 }
  0x43   : > { %3101 = vst [vmem:[#allocation20_spill] sm:$0xff] %v3100_v34  ;;  %v3111_v43 = vsel %vm1689_vm6, 4294967295, %v3110_v43  ;;  %vm1693_vm7 = vcmp.gt.f32.partialorder %v343_v23, 0.5  ;;  %v3113_v44 = vmov 0  ;;  %v373_v45 = vand.u32 2147483647, %v1647_v22 }
  0x44   : > { %3102 = vst [vmem:[#allocation21_spill] sm:$0xff] %v1675_v37  ;;  %v3114_v44 = vsel %vm1693_vm7, 4294967295, %v3113_v44  ;;  %v389_v46 = vsub.f32 0.0, %v369_v26  ;;  %v1699_v47 = vld [vmem:[%s1602_s29 + $0x60] sm:$0xff]  ;;  %vm1701_vm8 = vcmp.gt.f32.partialorder %v344_v24, 0.5  ;;  %v3117_v48 = vmov 0 }
  0x45   : > { %879 = vperm.xlu0 %1245, %v869_v2   ;;  %3105 = vst [vmem:[#allocation22_spill] sm:$0xff] %v3104_v38  ;;  %v3118_v48 = vsel %vm1701_vm8, 4294967295, %v3117_v48  ;;  %v374_v49 = vand.u32 2147483647, %v1651_v27  ;;  %v390_v50 = vsub.f32 0.0, %v370_v30  ;;  %v406_v51 = vsel %vm1653_vm0, %v1617_v3, %v386_v31  ;;  %v1710_v52 = vld [vmem:[%s1602_s29 + $0x68] sm:$0xff] }
  0x46   : > { %3108 = vst [vmem:[#allocation23_spill] sm:$0xff] %v3107_v39  ;;  %vm1712_vm9 = vcmp.gt.f32.partialorder %v345_v25, 0.5  ;;  %v3121_v53 = vmov 0  ;;  %v375_v54 = vand.u32 2147483647, %v1663_v32  ;;  %v391_v55 = vsub.f32 0.0, %v371_v35 }
  0x47   : > { %3109 = vst [vmem:[#allocation24_spill] sm:$0xff] %v1687_v42  ;;  %v3122_v53 = vsel %vm1712_vm9, 4294967295, %v3121_v53  ;;  %v407_v56 = vsel %vm1657_vm1, %v1623_v5, %v387_v36  ;;  %v1721_v57 = vld [vmem:[%s1602_s29 + $0x70] sm:$0xff]  ;;  %v376_v58 = vand.u32 2147483647, %v1675_v37  ;;  %v392_v60 = vsub.f32 0.0, %v372_v40 }
  0x48   : > { %3112 = vst [vmem:[#allocation25_spill] sm:$0xff] %v3111_v43  ;;  %v377_v59 = vand.u32 2147483647, %v1687_v42  ;;  %v408_v61 = vsel %vm1665_vm2, %v1626_v6, %v388_v41  ;;  %v1729_v62 = vld [vmem:[%s1602_s29 + $0x78] sm:$0xff]  ;;  %v378_v63 = vand.u32 2147483647, %v1699_v47  ;;  %v409_v1 = vsel %vm1669_vm3, %v1629_v7, %v389_v46 }
  0x49   : > { %3115 = vst [vmem:[#allocation26_spill] sm:$0xff] %v3114_v44  ;;  %v393_v0 = vsub.f32 0.0, %v373_v45  ;;  %v426_v2 = vmul.f32 1.442695, %v406_v51  ;;  %v379_v4 = vand.u32 2147483647, %v1710_v52  ;;  %v410_v9 = vsel %vm1677_vm4, %v1636_v12, %v390_v50 }
  0x4a   : > { %3116 = vst [vmem:[#allocation27_spill] sm:$0xff] %v1699_v47  ;;  %v394_v8 = vsub.f32 0.0, %v374_v49  ;;  %v428_v10 = vmul.f32 1.442695, %v407_v56  ;;  %v380_v11 = vand.u32 2147483647, %v1721_v57  ;;  %v411_v15 = vsel %vm1681_vm5, %v1639_v13, %v391_v55 }
  0x4b   : > { %3119 = vst [vmem:[#allocation28_spill] sm:$0xff] %v3118_v48  ;;  %v395_v14 = vsub.f32 0.0, %v375_v54  ;;  %v430_v16 = vmul.f32 1.442695, %v408_v61  ;;  %v381_v18 = vand.u32 2147483647, %v1729_v62  ;;  %v412_v20 = vsel %vm1689_vm6, %v1643_v17, %v392_v60 }
  0x4c   : > { %3120 = vst [vmem:[#allocation29_spill] sm:$0xff] %v1710_v52  ;;  %v396_v19 = vsub.f32 0.0, %v376_v58  ;;  %v432_v21 = vmul.f32 1.442695, %v409_v1  ;;  %v397_v23 = vsub.f32 0.0, %v377_v59  ;;  %v413_v24 = vsel %vm1693_vm7, %v1647_v22, %v393_v0  ;;  %v1763_v54 = vld [vmem:[%s1602_s29 + $0x80] sm:$0xff] }
  0x4d   : > { %3123 = vst [vmem:[#allocation30_spill] sm:$0xff] %v3122_v53  ;;  %1246 = vpow2.f32 %v426_v2  ;;  %v434_v25 = vmul.f32 1.442695, %v410_v9  ;;  %v398_v26 = vsub.f32 0.0, %v378_v63  ;;  %v414_v30 = vsel %vm1701_vm8, %v1651_v27, %v394_v8  ;;  %v1771_v59 = vld [vmem:[%s1602_s29 + $0x88] sm:$0xff]  ;;  %v1779_v0 = vld [vmem:[%s1602_s29 + $0x90] sm:$0xff] }
  0x4e   : > { %3124 = vst [vmem:[#allocation31_spill] sm:$0xff] %v1721_v57  ;;  %1248 = vpow2.f32 %v428_v10  ;;  %v436_v31 = vmul.f32 1.442695, %v411_v15  ;;  %v399_v35 = vsub.f32 0.0, %v379_v4  ;;  %v415_v36 = vsel %vm1712_vm9, %v1663_v32, %v395_v14  ;;  %v1787_v8 = vld [vmem:[%s1602_s29 + $0x98] sm:$0xff]  ;;  %s2821_s11 = scalar_lea.vmem [#allocation7], %s1181_s30 }
  0x4f   : > { %3125 = vst [vmem:[#allocation32_spill] sm:$0xff] %v1729_v62  ;;  %1250 = vpow2.f32 %v430_v16  ;;  %v438_v40 = vmul.f32 1.442695, %v412_v20  ;;  %v400_v41 = vsub.f32 0.0, %v380_v11  ;;  %v416_v45 = vsel %vm1653_vm0, %v1675_v37, %v396_v19  ;;  %s1182_s30 = smul.u32 160, %s1520_s25  ;;  %s1065_s12 = sshll.u32 %s2821_s11, 4  ;;  %s1066_s12 = int_to_ptr.vmem [resolvable:$true] %s1065_s12 }
  0x50   : > { %1252 = vpow2.f32 %v432_v21  ;;  %v440_v46 = vmul.f32 1.442695, %v413_v24  ;;  %v401_v49 = vsub.f32 0.0, %v381_v18  ;;  %v417_v50 = vsel %vm1657_vm1, %v1687_v42, %v397_v23  ;;  %3126 = vst [vmem:[#allocation33_spill] sm:$0xff] %v1763_v54  ;;  %s1052_s15 = scalar_lea.sflag [#allocation4], %s1596_s28  ;;  %s1406_s20 = scalar_lea.hbm %s2955_s6, 320 }
  0x51   : > { %1254 = vpow2.f32 %v434_v25  ;;  %v442_v51 = vmul.f32 1.442695, %v414_v30  ;;  %v418_v55 = vsel %vm1665_vm2, %v1699_v47, %v398_v26  ;;  %v444_v56 = vmul.f32 1.442695, %v415_v36  ;;  %3128 = vst [vmem:[#allocation35_spill] sm:$0xff] %v1771_v59  ;;  %s1064_s18 = scalar_lea.hbm %s2955_s6, %s1182_s30 }
  0x52   : > { %1256 = vpow2.f32 %v436_v31  ;;  %v419_v60 = vsel %vm1669_vm3, %v1710_v52, %v399_v35  ;;  %v446_v61 = vmul.f32 1.442695, %v416_v45  ;;  %3130 = vst [vmem:[#allocation37_spill] sm:$0xff] %v1779_v0  ;;  %v420_v1 = vsel %vm1677_vm4, %v1721_v57, %v400_v41  ;;  %s1067_s13 = sshll.u32 %s1064_s18, 4  ;;  %s1068_s13 = int_to_ptr.hbm [resolvable:$true] %s1067_s13 }
  0x53   : > { %v1768_v58 = vpop.eup %1246  ;;  %1258 = vpow2.f32 %v438_v40  ;;  %v448_v2 = vmul.f32 1.442695, %v417_v50  ;;  %3132 = vst [vmem:[#allocation39_spill] sm:$0xff] %v1787_v8  ;;  %v382_v9 = vand.u32 2147483647, %v1763_v54  ;;  %v421_v10 = vsel %vm1681_vm5, %v1729_v62, %v401_v49  ;;  %s1400_s7 = sshra.s32 %s1068_s13, 4  ;;  %s1401_s7 = int_to_ptr.hbm [resolvable:$true] %s1400_s7 }
  0x54   : > { %3127 = vst [vmem:[#allocation34_spill] sm:$0xff] %v1768_v58  ;;  %v1776_v63 = vpop.eup %1248  ;;  %1260 = vpow2.f32 %v440_v46  ;;  %v450_v11 = vmul.f32 1.442695, %v418_v55  ;;  %v383_v15 = vand.u32 2147483647, %v1771_v59  ;;  %v1805_v30 = vadd.f32 1.0, %v1768_v58  ;;  %p1407_p7 = scmp.lt.s32.totalorder %s1401_s7, %s2955_s6 }
  0x55   : > { %3129 = vst [vmem:[#allocation36_spill] sm:$0xff] %v1776_v63  ;;  %v1784_v4 = vpop.eup %1250  ;;  %1262 = vpow2.f32 %v442_v51  ;;  %v452_v16 = vmul.f32 1.442695, %v419_v60  ;;  %v384_v19 = vand.u32 2147483647, %v1779_v0  ;;  %v402_v26 = vsub.f32 0.0, %v382_v9 }
  0x56   : > { %3131 = vst [vmem:[#allocation38_spill] sm:$0xff] %v1784_v4  ;;  %v1793_v14 = vpop.eup %1252  ;;  %1264 = vpow2.f32 %v444_v56  ;;  %v454_v20 = vmul.f32 1.442695, %v420_v1  ;;  %v385_v23 = vand.u32 2147483647, %v1787_v8  ;;  %v403_v35 = vsub.f32 0.0, %v383_v15 }
  0x57   : > { %3133 = vst [vmem:[#allocation40_spill] sm:$0xff] %v1793_v14  ;;  %v1796_v18 = vpop.eup %1254  ;;  %1266 = vpow2.f32 %v446_v61  ;;  %v456_v24 = vmul.f32 1.442695, %v421_v10  ;;  %v1810_v36 = vadd.f32 1.0, %v1776_v63  ;;  %v404_v41 = vsub.f32 0.0, %v384_v19  ;;  %s1402_s14 = scalar_lea.hbm %s1401_s7, 160 }
  0x58   : > { %3134 = vst [vmem:[#allocation41_spill] sm:$0xff] %v1796_v18  ;;  %v1799_v21 = vpop.eup %1256  ;;  %1268 = vpow2.f32 %v448_v2  ;;  %v1815_v45 = vadd.f32 1.0, %v1784_v4  ;;  %v405_v49 = vsub.f32 0.0, %v385_v23  ;;  %v1820_v50 = vadd.f32 1.0, %v1793_v14  ;;  %p1403_p4 = scmp.ne.s32.totalorder %s1401_s7, %s1402_s14  ;;  %p1408_p5 = scmp.lt.s32.totalorder %s1406_s20, %s1402_s14 }
  0x59   : > { %3135 = vst [vmem:[#allocation42_spill] sm:$0xff] %v1799_v21  ;;  %v1802_v25 = vpop.eup %1258  ;;  %1270 = vpow2.f32 %v450_v11  ;;  %v422_v55 = vsel %vm1689_vm6, %v1763_v54, %v402_v26  ;;  %v1828_v56 = vadd.f32 1.0, %v1796_v18  ;;  %v423_v61 = vsel %vm1693_vm7, %v1771_v59, %v403_v35 }
  0x5a   : > { %3136 = vst [vmem:[#allocation43_spill] sm:$0xff] %v1802_v25  ;;  %v1807_v31 = vpop.eup %1260  ;;  %1272 = vpow2.f32 %v452_v16  ;;  %v1837_v1 = vadd.f32 1.0, %v1799_v21  ;;  %v424_v9 = vsel %vm1701_vm8, %v1779_v0, %v404_v41  ;;  %v1846_v10 = vadd.f32 1.0, %v1802_v25  ;;  %p1404_p6 = pnand %p1403_p4, %p1551_p11  ;;  %p1409_p8 = por %p1408_p5, %p1407_p7 }
  0x5b   : > { %3137 = vst [vmem:[#allocation44_spill] sm:$0xff] %v1807_v31  ;;  %v1812_v40 = vpop.eup %1262  ;;  %1274 = vpow2.f32 %v454_v20  ;;  %v425_v15 = vsel %vm1712_vm9, %v1787_v8, %v405_v49  ;;  %v458_v16 = vmul.f32 1.442695, %v422_v55  ;;  %v460_v20 = vmul.f32 1.442695, %v423_v61 }
  0x5c   : > { %3138 = vst [vmem:[#allocation45_spill] sm:$0xff] %v1812_v40  ;;  %v1817_v46 = vpop.eup %1264  ;;  %1276 = vpow2.f32 %v456_v24  ;;  %v497_v23 = vand.u32 2147483648, %v1805_v30  ;;  %v462_v26 = vmul.f32 1.442695, %v424_v9  ;;  %v512_v35 = vand.u32 2147483648, %v1810_v36  ;;  %p1405_p0 = pneg %p1404_p6 }
  0x5d   : > { %3139 = vst [vmem:[#allocation46_spill] sm:$0xff] %v1817_v46  ;;  %v1822_v51 = vpop.eup %1266  ;;  %1278 = vrcp.f32 %v1805_v30  ;;  %v464_v49 = vmul.f32 1.442695, %v425_v15  ;;  %v495_v55 = vand.u32 2147483647, %v1805_v30  ;;  %v1870_v61 = vadd.f32 1.0, %v1807_v31 }
  0x5e   : > { %3140 = vst [vmem:[#allocation47_spill] sm:$0xff] %v1822_v51  ;;  %v1831_v60 = vpop.eup %1268  ;;  %1280 = vrcp.f32 %v1810_v36  ;;  %v510_v48 = vand.u32 2147483647, %v1810_v36  ;;  %v527_v9 = vand.u32 2147483648, %v1815_v45  ;;  %v1877_v43 = vadd.f32 1.0, %v1812_v40  ;;  %p1410_p9 = pnand %p1409_p8, %p1405_p0 }
  0x5f   : > { %3141 = vst [vmem:[#allocation48_spill] sm:$0xff] %v1831_v60  ;;  %v1840_v2 = vpop.eup %1270  ;;  %1282 = vrcp.f32 %v1815_v45  ;;  %v1881_v39 = vor.u32 1.1754944e-38, %v497_v23  ;;  %v1887_v34 = vor.u32 1.1754944e-38, %v512_v35  ;;  %v542_v33 = vand.u32 2147483648, %v1820_v50 }
  0x60   : > { %3142 = vst [vmem:[#allocation49_spill] sm:$0xff] %v1840_v2  ;;  %v1849_v11 = vpop.eup %1272  ;;  %1284 = vrcp.f32 %v1820_v50  ;;  %vm491_vm10 = vweird.f32 %v1805_v30  ;;  %v525_v23 = vand.u32 2147483647, %v1815_v45  ;;  %v1901_v40 = vadd.f32 1.0, %v1822_v51 }
  0x61   : > { %3143 = vst [vmem:[#allocation50_spill] sm:$0xff] %v1849_v11  ;;  %v1855_v19 = vpop.eup %1274  ;;  %1286 = vrcp.f32 %v1828_v56  ;;  %v1904_v35 = vadd.f32 1.0, %v1831_v60  ;;  %v1913_v31 = vadd.f32 1.0, %v1840_v2  ;;  %v557_v25 = vand.u32 2147483648, %v1828_v56 }
  0x62   : > { %3144 = vst [vmem:[#allocation51_spill] sm:$0xff] %v1855_v19  ;;  %v1859_v24 = vpop.eup %1276  ;;  %1288 = vrcp.f32 %v1837_v1  ;;  %v572_v18 = vand.u32 2147483648, %v1837_v1  ;;  %v1941_v58 = vadd.f32 1.0, %v1855_v19  ;;  %v570_v8 = vand.u32 2147483647, %v1837_v1 }
  0x63   : > { %3145 = vst [vmem:[#allocation52_spill] sm:$0xff] %v1859_v24  ;;  %v1863_v41 = vpop.eup %1278  ;;  %1290 = vrcp.f32 %v1846_v10  ;;  %v1950_v54 = vadd.f32 1.0, %v1859_v24  ;;  %v1956_v57 = vor.u32 1.1754944e-38, %v557_v25  ;;  %vm1964_vm14 = vcmp.eq.f32.partialorder %v495_v55, 8.507059e+37 }
  0x64   : > { %v1867_v53 = vpop.eup %1280  ;;  %1292 = vpow2.f32 %v458_v16  ;;  %v487_v15 = vmul.f32 %v1863_v41, %v1805_v30  ;;  %vm492_vm15 = vweird.f32 %v1863_v41  ;;  %vm1975_vm12 = vcmp.eq.f32.partialorder %v510_v48, 8.507059e+37 }
  0x65   : > { %v1874_v44 = vpop.eup %1282  ;;  %1294 = vpow2.f32 %v460_v20  ;;  %v502_v16 = vmul.f32 %v1867_v53, %v1810_v36  ;;  %v1893_v20 = vadd.f32 1.0, %v1817_v46  ;;  %vm507_vm11 = vweird.f32 %v1867_v53  ;;  %vm1993_vm13 = vmor %vm491_vm10, %vm492_vm15 }
  0x66   : > { %v1883_v38 = vpop.eup %1284  ;;  %1296 = vpow2.f32 %v462_v26  ;;  %v488_v28 = vsub.f32 1.0, %v487_v15  ;;  %v517_v21 = vmul.f32 %v1874_v44, %v1815_v45  ;;  %v587_v48 = vand.u32 2147483648, %v1846_v10 }
  0x67   : > { %v1890_v29 = vpop.eup %1286  ;;  %1298 = vpow2.f32 %v464_v49  ;;  %v1907_v49 = vor.u32 1.1754944e-38, %v527_v9  ;;  %v503_v60 = vsub.f32 1.0, %v502_v16  ;;  %v1922_v9 = vor.u32 1.1754944e-38, %v542_v33 }
  0x68   : > { %v1898_v26 = vpop.eup %1288  ;;  %1300 = vrcp.f32 %v1870_v61  ;;  %v532_v15 = vmul.f32 %v1883_v38, %v1820_v50  ;;  %v547_v2 = vmul.f32 %v1890_v29, %v1828_v56  ;;  %v555_v16 = vand.u32 2147483647, %v1828_v56 }
  0x69   : > { %v1910_v46 = vpop.eup %1290  ;;  %1302 = vrcp.f32 %v1877_v43  ;;  %v562_v4 = vmul.f32 %v1898_v26, %v1837_v1  ;;  %v1938_v33 = vadd.f32 1.0, %v1849_v11  ;;  %v489_v11 = vmul.f32 %v1863_v41, %v488_v28 }
  0x6a   : > { %v1917_v51 = vpop.eup %1292  ;;  %v577_v0 = vmul.f32 %v1910_v46, %v1846_v10  ;;  %v504_v24 = vmul.f32 %v1867_v53, %v503_v60  ;;  %v518_v42 = vsub.f32 1.0, %v517_v21  ;;  %v548_v55 = vsub.f32 1.0, %v547_v2 }
  0x6b   : > { %3146 = vst [vmem:[#allocation53_spill] sm:$0xff] %v1917_v51  ;;  %v1925_v14 = vpop.eup %1294  ;;  %v1953_v62 = vadd.f32 1.0, %v1917_v51  ;;  %v1969_v51 = vor.u32 1.1754944e-38, %v572_v18  ;;  %v563_v37 = vsub.f32 1.0, %v562_v4  ;;  %v585_v21 = vand.u32 2147483647, %v1846_v10 }
  0x6c   : > { %3147 = vst [vmem:[#allocation54_spill] sm:$0xff] %v1925_v14  ;;  %v1935_v63 = vpop.eup %1296  ;;  %v1962_v52 = vadd.f32 1.0, %v1925_v14  ;;  %v533_v14 = vsub.f32 1.0, %v532_v15  ;;  %v578_v18 = vsub.f32 1.0, %v577_v0  ;;  %v490_v27 = vadd.f32 %v1863_v41, %v489_v11 }
  0x6d   : > { %3148 = vst [vmem:[#allocation55_spill] sm:$0xff] %v1935_v63  ;;  %v1947_v59 = vpop.eup %1298  ;;  %v1980_v32 = vadd.f32 1.0, %v1935_v63  ;;  %v505_v0 = vadd.f32 %v1867_v53, %v504_v24  ;;  %v519_v2 = vmul.f32 %v1874_v44, %v518_v42  ;;  %vm2000_vm8 = vcmp.eq.f32.partialorder %v525_v23, 8.507059e+37 }
  0x6e   : > { %3149 = vst [vmem:[#allocation56_spill] sm:$0xff] %v1947_v59  ;;  %v1959_v19 = vpop.eup %1300  ;;  %v1985_v60 = vadd.f32 1.0, %v1947_v59  ;;  %vm3158_vm7 = vweird.f32 %v1810_v36  ;;  %v534_v63 = vmul.f32 %v1883_v38, %v533_v14  ;;  %v3161_v42 = vand.u32 2147483647, %v1820_v50 }
  0x6f   : > { %v1972_v28 = vpop.eup %1302  ;;  %v592_v15 = vmul.f32 %v1959_v19, %v1870_v61  ;;  %vm2008_vm6 = vmor %vm3158_vm7, %vm507_vm11  ;;  %v549_v23 = vmul.f32 %v1890_v29, %v548_v55  ;;  %vm2021_vm9 = vcmp.eq.f32.partialorder %v555_v16, 8.507059e+37  ;;  %v564_v36 = vmul.f32 %v1898_v26, %v563_v37 }
  0x70   : > { %v607_v11 = vmul.f32 %v1972_v28, %v1877_v43  ;;  %vm2016_vm15 = vcmp.eq.f32.partialorder %v3161_v42, 8.507059e+37  ;;  %vm2028_vm5 = vcmp.eq.f32.partialorder %v570_v8, 8.507059e+37  ;;  %v579_v42 = vmul.f32 %v1910_v46, %v578_v18 }
  0x71   : > { %v600_v17 = vand.u32 2147483647, %v1870_v61  ;;  %v602_v55 = vand.u32 2147483648, %v1870_v61  ;;  %v494_v16 = vsel %vm1993_vm13, %v1863_v41, %v490_v27  ;;  %vm3168_vm10 = vweird.f32 %v1874_v44 }
  0x72   : > { %vm3169_vm7 = vweird.f32 %v1815_v45  ;;  %vm567_vm11 = vweird.f32 %v1898_v26  ;;  %v593_v8 = vsub.f32 1.0, %v592_v15  ;;  %v509_v18 = vsel %vm2008_vm6, %v1867_v53, %v505_v0 }
  0x73   : > { %vm2042_vm4 = vmor %vm3169_vm7, %vm3168_vm10  ;;  %v520_v4 = vadd.f32 %v1874_v44, %v519_v2  ;;  %vm3172_vm13 = vweird.f32 %v1883_v38  ;;  %vm3173_vm2 = vweird.f32 %v1820_v50  ;;  %v608_v45 = vsub.f32 1.0, %v607_v11 }
  0x74   : > { %vm2056_vm1 = vmor %vm3173_vm2, %vm3172_vm13  ;;  %1304 = vrcp.f32 %v1893_v20  ;;  %v535_v41 = vadd.f32 %v1883_v38, %v534_v63  ;;  %v550_v15 = vadd.f32 %v1890_v29, %v549_v23  ;;  %vm3176_vm10 = vweird.f32 %v1890_v29 }
  0x75   : > { %vm3177_vm6 = vweird.f32 %v1828_v56  ;;  %v565_v50 = vadd.f32 %v1898_v26, %v564_v36  ;;  %1306 = vrcp.f32 %v1901_v40  ;;  %vm3180_vm2 = vweird.f32 %v1837_v1 }
  0x76   : > { %vm2067_vm7 = vmor %vm3177_vm6, %vm3176_vm10  ;;  %v580_v63 = vadd.f32 %v1910_v46, %v579_v42  ;;  %vm2080_vm3 = vcmp.eq.f32.partialorder %v585_v21, 8.507059e+37  ;;  %v588_v56 = vor.u32 1.1754944e-38, %v587_v48  ;;  %1308 = vrcp.f32 %v1904_v35 }
  0x77   : > { %vm2075_vm13 = vmor %vm3180_vm2, %vm567_vm11  ;;  %v2088_v11 = vsel %vm1964_vm14, %v1881_v39, %v494_v16  ;;  %vm3185_vm10 = vweird.f32 %v1910_v46  ;;  %vm3186_vm11 = vweird.f32 %v1846_v10  ;;  %v594_v21 = vmul.f32 %v1959_v19, %v593_v8 }
  0x78   : > { %vm2094_vm6 = vmor %vm3186_vm11, %vm3185_vm10  ;;  %vm2099_vm2 = vcmp.eq.f32.partialorder %v600_v17, 8.507059e+37  ;;  %v603_v48 = vor.u32 1.1754944e-38, %v602_v55  ;;  %v2106_v39 = vsel %vm1975_vm12, %v1887_v34, %v509_v18  ;;  %v524_v47 = vsel %vm2042_vm4, %v1874_v44, %v520_v4 }
  0x79   : > { %v609_v10 = vmul.f32 %v1972_v28, %v608_v45  ;;  %1310 = vrcp.f32 %v1913_v31  ;;  %v539_v17 = vsel %vm2056_vm1, %v1883_v38, %v535_v41  ;;  %v554_v23 = vsel %vm2067_vm7, %v1890_v29, %v550_v15 }
  0x7a   : > { %v569_v34 = vsel %vm2075_vm13, %v1898_v26, %v565_v50  ;;  %vm597_vm12 = vweird.f32 %v1959_v19  ;;  %v2123_v25 = vpop.eup %1304  ;;  %v584_v44 = vsel %vm2094_vm6, %v1910_v46, %v580_v63  ;;  %vm611_vm4 = vweird.f32 %v1877_v43 }
  0x7b   : > { %vm612_vm1 = vweird.f32 %v1972_v28  ;;  %1312 = vrcp.f32 %v1938_v33  ;;  %v2131_v38 = vpop.eup %1306  ;;  %v2136_v29 = vsel %vm2000_vm8, %v1907_v49, %v524_v47  ;;  %v595_v26 = vadd.f32 %v1959_v19, %v594_v21 }
  0x7c   : > { %v615_v36 = vand.u32 2147483647, %v1877_v43  ;;  %v617_v42 = vand.u32 2147483648, %v1877_v43  ;;  %v2141_v46 = vpop.eup %1308  ;;  %v2146_v55 = vsel %vm2016_vm15, %v1922_v9, %v539_v17  ;;  %v2151_v16 = vsel %vm2021_vm9, %v1956_v57, %v554_v23  ;;  %vm2174_vm9 = vmor %vm611_vm4, %vm612_vm1 }
  0x7d   : > { %vm3191_vm8 = vweird.f32 %v1870_v61  ;;  %v610_v49 = vadd.f32 %v1972_v28, %v609_v10  ;;  %1314 = vrcp.f32 %v1941_v58  ;;  %v2164_v9 = vsel %vm2028_vm5, %v1969_v51, %v569_v34 }
  0x7e   : > { %vm2155_vm14 = vmor %vm3191_vm8, %vm597_vm12  ;;  %v2168_v22 = vsel %vm2080_vm3, %v588_v56, %v584_v44  ;;  %v622_v61 = vmul.f32 %v2123_v25, %v1893_v20  ;;  %v632_v24 = vand.u32 2147483648, %v1893_v20  ;;  %vm626_vm5 = vweird.f32 %v1893_v20 }
  0x7f   : > { %v2181_v14 = vpop.eup %1310  ;;  %v630_v51 = vand.u32 2147483647, %v1893_v20  ;;  %v637_v37 = vmul.f32 %v2131_v38, %v1901_v40  ;;  %v652_v43 = vmul.f32 %v2141_v46, %v1904_v35  ;;  %v599_v8 = vsel %vm2155_vm14, %v1959_v19, %v595_v26 }
  0x80   : > { %vm2192_vm3 = vcmp.eq.f32.partialorder %v615_v36, 8.507059e+37  ;;  %v618_v4 = vor.u32 1.1754944e-38, %v617_v42  ;;  %v667_v27 = vmul.f32 %v2181_v14, %v1913_v31  ;;  %v614_v41 = vsel %vm2174_vm9, %v1972_v28, %v610_v49 }
  0x81   : > { %v2198_v45 = vpop.eup %1312  ;;  %vm641_vm15 = vweird.f32 %v1901_v40  ;;  %v647_v15 = vand.u32 2147483648, %v1901_v40  ;;  %1316 = vrcp.f32 %v1950_v54  ;;  %v623_v19 = vsub.f32 1.0, %v622_v61 }
  0x82   : > { %v2206_v53 = vor.u32 1.1754944e-38, %v632_v24  ;;  %v645_v50 = vand.u32 2147483647, %v1901_v40  ;;  %v662_v0 = vand.u32 2147483648, %v1904_v35  ;;  %v2214_v2 = vsel %vm2099_vm2, %v603_v48, %v599_v8 }
  0x83   : > { %v2210_v63 = vpop.eup %1314  ;;  %v638_v28 = vsub.f32 1.0, %v637_v37  ;;  %v653_v56 = vsub.f32 1.0, %v652_v43  ;;  %vm656_vm7 = vweird.f32 %v1904_v35  ;;  %v2219_v1 = vsel %vm2192_vm3, %v618_v4, %v614_v41 }
  0x84   : > { %v660_v21 = vand.u32 2147483647, %v1904_v35  ;;  %v668_v47 = vsub.f32 1.0, %v667_v27  ;;  %v682_v10 = vmul.f32 %v2198_v45, %v1938_v33  ;;  %vm627_vm13 = vweird.f32 %v2123_v25 }
  0x85   : > { %v2225_v17 = vor.u32 1.1754944e-38, %v647_v15  ;;  %vm671_vm10 = vweird.f32 %v1913_v31  ;;  %v697_v30 = vmul.f32 %v2210_v63, %v1941_v58  ;;  %v624_v48 = vmul.f32 %v2123_v25, %v623_v19  ;;  %vm2265_vm8 = vmor %vm626_vm5, %vm627_vm13 }
  0x86   : > { %vm2231_vm11 = vcmp.eq.f32.partialorder %v630_v51, 8.507059e+37  ;;  %v2235_v34 = vor.u32 1.1754944e-38, %v662_v0  ;;  %v675_v44 = vand.u32 2147483647, %v1913_v31  ;;  %v677_v26 = vand.u32 2147483648, %v1913_v31 }
  0x87   : > { %v2239_v36 = vpop.eup %1316  ;;  %v639_v42 = vmul.f32 %v2131_v38, %v638_v28  ;;  %vm642_vm6 = vweird.f32 %v2131_v38  ;;  %vm2243_vm2 = vcmp.eq.f32.partialorder %v645_v50, 8.507059e+37  ;;  %v654_v49 = vmul.f32 %v2141_v46, %v653_v56 }
  0x88   : > { %1318 = vrcp.f32 %v1953_v62  ;;  %vm2249_vm12 = vcmp.eq.f32.partialorder %v660_v21, 8.507059e+37  ;;  %v669_v61 = vmul.f32 %v2181_v14, %v668_v47  ;;  %v683_v24 = vsub.f32 1.0, %v682_v10  ;;  %vm2279_vm3 = vmor %vm641_vm15, %vm642_vm6 }
  0x89   : > { %v690_v51 = vand.u32 2147483647, %v1938_v33  ;;  %v692_v37 = vand.u32 2147483648, %v1938_v33  ;;  %vm657_vm4 = vweird.f32 %v2141_v46  ;;  %vm686_vm1 = vweird.f32 %v1938_v33 }
  0x8a   : > { %v698_v43 = vsub.f32 1.0, %v697_v30  ;;  %v712_v8 = vmul.f32 %v2239_v36, %v1950_v54  ;;  %v625_v18 = vadd.f32 %v2123_v25, %v624_v48  ;;  %vm672_vm14 = vweird.f32 %v2181_v14  ;;  %vm2288_vm5 = vmor %vm656_vm7, %vm657_vm4 }
  0x8b   : > { %vm2270_vm9 = vcmp.eq.f32.partialorder %v675_v44, 8.507059e+37  ;;  %v678_v41 = vor.u32 1.1754944e-38, %v677_v26  ;;  %v640_v15 = vadd.f32 %v2131_v38, %v639_v42  ;;  %v655_v20 = vadd.f32 %v2141_v46, %v654_v49  ;;  %vm2302_vm13 = vmor %vm671_vm10, %vm672_vm14 }
  0x8c   : > { %v705_v50 = vand.u32 2147483647, %v1941_v58  ;;  %1320 = vrcp.f32 %v1962_v52  ;;  %v670_v28 = vadd.f32 %v2181_v14, %v669_v61  ;;  %v684_v40 = vmul.f32 %v2198_v45, %v683_v24 }
  0x8d   : > { %vm2294_vm15 = vcmp.eq.f32.partialorder %v690_v51, 8.507059e+37  ;;  %v693_v21 = vor.u32 1.1754944e-38, %v692_v37  ;;  %v699_v35 = vmul.f32 %v2210_v63, %v698_v43  ;;  %vm701_vm7 = vweird.f32 %v1941_v58 }
  0x8e   : > { %v2298_v47 = vpop.eup %1318  ;;  %v707_v30 = vand.u32 2147483648, %v1941_v58  ;;  %v713_v48 = vsub.f32 1.0, %v712_v8  ;;  %v629_v44 = vsel %vm2265_vm8, %v2123_v25, %v625_v18  ;;  %vm687_vm6 = vweird.f32 %v2198_v45 }
  0x8f   : > { %v727_v31 = vmul.f32 %v2298_v47, %v1953_v62  ;;  %1322 = vrcp.f32 %v1980_v32  ;;  %v644_v26 = vsel %vm2279_vm3, %v2131_v38, %v640_v15  ;;  %v659_v42 = vsel %vm2288_vm5, %v2141_v46, %v655_v20  ;;  %vm2342_vm8 = vmor %vm686_vm1, %vm687_vm6 }
  0x90   : > { %vm702_vm10 = vweird.f32 %v2210_v63  ;;  %vm2323_vm4 = vcmp.eq.f32.partialorder %v705_v50, 8.507059e+37  ;;  %v674_v25 = vsel %vm2302_vm13, %v2181_v14, %v670_v28  ;;  %v685_v61 = vadd.f32 %v2198_v45, %v684_v40 }
  0x91   : > { %v720_v24 = vand.u32 2147483647, %v1950_v54  ;;  %1324 = vrcp.f32 %v1985_v60  ;;  %v2338_v46 = vsel %vm2231_vm11, %v2206_v53, %v629_v44  ;;  %v700_v14 = vadd.f32 %v2210_v63, %v699_v35  ;;  %vm2356_vm11 = vmor %vm701_vm7, %vm702_vm10 }
  0x92   : > { %v2333_v38 = vpop.eup %1320  ;;  %v714_v37 = vmul.f32 %v2239_v36, %v713_v48  ;;  %v722_v43 = vand.u32 2147483648, %v1950_v54  ;;  %v2352_v8 = vsel %vm2243_vm2, %v2225_v17, %v644_v26  ;;  %v708_v33 = vor.u32 1.1754944e-38, %v707_v30  ;;  %v3251_v30 = vld [vmem:[#allocation32_spill] sm:$0xff] }
  0x93   : > { %v728_v23 = vsub.f32 1.0, %v727_v31  ;;  %v742_v18 = vmul.f32 %v2333_v38, %v1962_v52  ;;  %v2365_v4 = vsel %vm2249_vm12, %v2235_v34, %v659_v42  ;;  %v2369_v17 = vsel %vm2270_vm9, %v678_v41, %v674_v25 }
  0x94   : > { %vm716_vm2 = vweird.f32 %v1950_v54  ;;  %vm717_vm1 = vweird.f32 %v2239_v36  ;;  %v689_v59 = vsel %vm2342_vm8, %v2198_v45, %v685_v61  ;;  %vm2378_vm14 = vcmp.eq.f32.partialorder %v720_v24, 8.507059e+37 }
  0x95   : > { %v2373_v58 = vpop.eup %1322  ;;  %v735_v34 = vand.u32 2147483647, %v1953_v62  ;;  %v743_v57 = vsub.f32 1.0, %v742_v18  ;;  %v704_v27 = vsel %vm2356_vm11, %v2210_v63, %v700_v14  ;;  %v715_v54 = vadd.f32 %v2239_v36, %v714_v37  ;;  %vm2391_vm12 = vmor %vm716_vm2, %vm717_vm1 }
  0x96   : > { %v723_v41 = vor.u32 1.1754944e-38, %v722_v43  ;;  %v757_v19 = vmul.f32 %v2373_v58, %v1980_v32  ;;  %v729_v50 = vmul.f32 %v2298_v47, %v728_v23  ;;  %vm731_vm9 = vweird.f32 %v1953_v62 }
  0x97   : > { %v2389_v20 = vpop.eup %1324  ;;  %v737_v0 = vand.u32 2147483648, %v1953_v62  ;;  %vm746_vm3 = vweird.f32 %v1962_v52  ;;  %v2401_v63 = vsel %vm2294_vm15, %v693_v21, %v689_v59  ;;  %v750_v28 = vand.u32 2147483647, %v1962_v52  ;;  %v3269_v59 = vld [vmem:[#allocation50_spill] sm:$0xff] }
  0x98   : > { %v758_v40 = vsub.f32 1.0, %v757_v19  ;;  %v772_v10 = vmul.f32 %v2389_v20, %v1985_v60  ;;  %v2408_v35 = vsel %vm2323_vm4, %v708_v33, %v704_v27  ;;  %vm732_vm5 = vweird.f32 %v2298_v47  ;;  %v3245_v19 = vld [vmem:[#allocation18_spill] sm:$0xff] }
  0x99   : > { %vm2411_vm13 = vcmp.eq.f32.partialorder %v735_v34, 8.507059e+37  ;;  %v744_v56 = vmul.f32 %v2333_v38, %v743_v57  ;;  %v719_v21 = vsel %vm2391_vm12, %v2239_v36, %v715_v54  ;;  %v752_v48 = vand.u32 2147483648, %v1962_v52  ;;  %vm2427_vm7 = vmor %vm731_vm9, %vm732_vm5  ;;  %v3243_v54 = vld [vmem:[#allocation14_spill] sm:$0xff]  ;;  %v3264_v52 = vld [vmem:[#allocation45_spill] sm:$0xff] }
  0x9a   : > { %v765_v44 = vand.u32 2147483647, %v1980_v32  ;;  %v773_v31 = vsub.f32 1.0, %v772_v10  ;;  %v730_v26 = vadd.f32 %v2298_v47, %v729_v50  ;;  %vm747_vm15 = vweird.f32 %v2333_v38  ;;  %v3246_v50 = vld [vmem:[#allocation21_spill] sm:$0xff]  ;;  %v3250_v10 = vld [vmem:[#allocation31_spill] sm:$0xff] }
  0x9b   : > { %v759_v42 = vmul.f32 %v2373_v58, %v758_v40  ;;  %v767_v49 = vand.u32 2147483648, %v1980_v32  ;;  %v738_v36 = vor.u32 1.1754944e-38, %v737_v0  ;;  %vm2431_vm6 = vcmp.eq.f32.partialorder %v750_v28, 8.507059e+37  ;;  %vm2447_vm8 = vmor %vm746_vm3, %vm747_vm15  ;;  %v3247_v0 = vld [vmem:[#allocation24_spill] sm:$0xff]  ;;  %v3249_v28 = vld [vmem:[#allocation29_spill] sm:$0xff] }
  0x9c   : > { %v780_v24 = vand.u32 2147483647, %v1985_v60  ;;  %v782_v51 = vand.u32 2147483648, %v1985_v60  ;;  %v745_v14 = vadd.f32 %v2333_v38, %v744_v56  ;;  %vm761_vm10 = vweird.f32 %v1980_v32  ;;  %v3252_v56 = vld [vmem:[#allocation33_spill] sm:$0xff] }
  0x9d   : > { %vm762_vm4 = vweird.f32 %v2373_v58  ;;  %v774_v62 = vmul.f32 %v2389_v20, %v773_v31  ;;  %v2443_v37 = vsel %vm2378_vm14, %v723_v41, %v719_v21  ;;  %v753_v53 = vor.u32 1.1754944e-38, %v752_v48  ;;  %v3244_v41 = vld [vmem:[#allocation15_spill] sm:$0xff]  ;;  %v3254_v48 = vld [vmem:[#allocation37_spill] sm:$0xff] }
  0x9e   : > { %vm2451_vm11 = vcmp.eq.f32.partialorder %v765_v44, 8.507059e+37  ;;  %vm776_vm2 = vweird.f32 %v1985_v60  ;;  %v734_v32 = vsel %vm2427_vm7, %v2298_v47, %v730_v26  ;;  %v760_v23 = vadd.f32 %v2373_v58, %v759_v42  ;;  %vm2461_vm14 = vmor %vm761_vm10, %vm762_vm4  ;;  %v3248_v60 = vld [vmem:[#allocation27_spill] sm:$0xff]  ;;  %v3256_v26 = vld [vmem:[#allocation34_spill] sm:$0xff] }
  0x9f   : > { %v768_v18 = vor.u32 1.1754944e-38, %v767_v49  ;;  %vm777_vm1 = vweird.f32 %v2389_v20  ;;  %vm2465_vm12 = vcmp.eq.f32.partialorder %v780_v24, 8.507059e+37  ;;  %v783_v15 = vor.u32 1.1754944e-38, %v782_v51  ;;  %v3253_v21 = vld [vmem:[#allocation35_spill] sm:$0xff]  ;;  %v3257_v49 = vld [vmem:[#allocation36_spill] sm:$0xff]  ;;  %v3260_v51 = vld [vmem:[#allocation41_spill] sm:$0xff] }
  0xa0   : > { %vm786_vm9 = vcmp.ge.f32.partialorder %v1617_v3, 0.0  ;;  %v749_v47 = vsel %vm2447_vm8, %v2333_v38, %v745_v14  ;;  %v775_v34 = vadd.f32 %v2389_v20, %v774_v62  ;;  %vm790_vm7 = vcmp.ge.f32.partialorder %v1636_v12, 0.0  ;;  %vm2483_vm4 = vmor %vm776_vm2, %vm777_vm1  ;;  %v3242_v38 = vld [vmem:[#allocation13_spill] sm:$0xff]  ;;  %v3255_v44 = vld [vmem:[#allocation39_spill] sm:$0xff] }
  0xa1   : > { %v739_v57 = vsel %vm2411_vm13, %v738_v36, %v734_v32  ;;  %vm792_vm8 = vcmp.ge.f32.partialorder %v3242_v38, 0.0  ;;  %v764_v45 = vsel %vm2461_vm14, %v2373_v58, %v760_v23  ;;  %vm796_vm13 = vcmp.ge.f32.partialorder %v3246_v50, 0.0  ;;  %v3258_v36 = vld [vmem:[#allocation38_spill] sm:$0xff]  ;;  %v3263_v23 = vld [vmem:[#allocation44_spill] sm:$0xff] }
  0xa2   : > { %vm799_vm1 = vcmp.ge.f32.partialorder %v3249_v28, 0.0  ;;  %v754_v40 = vsel %vm2431_vm6, %v753_v53, %v749_v47  ;;  %vm800_vm3 = vcmp.ge.f32.partialorder %v3250_v10, 0.0  ;;  %vm801_vm5 = vcmp.ge.f32.partialorder %v3251_v30, 0.0  ;;  %v3261_v62 = vld [vmem:[#allocation42_spill] sm:$0xff]  ;;  %v3262_v53 = vld [vmem:[#allocation43_spill] sm:$0xff]  ;;  %v3311_v10 = vld [vmem:[#allocation20_spill] sm:$0xff] }
  0xa3   : > { %vm802_vm15 = vcmp.ge.f32.partialorder %v3252_v56, 0.0  ;;  %v779_v58 = vsel %vm2483_vm4, %v2389_v20, %v775_v34  ;;  %vm803_vm14 = vcmp.ge.f32.partialorder %v3253_v21, 0.0  ;;  %vm804_vm10 = vcmp.ge.f32.partialorder %v3254_v48, 0.0  ;;  %v3259_v20 = vld [vmem:[#allocation40_spill] sm:$0xff]  ;;  %v3265_v34 = vld [vmem:[#allocation46_spill] sm:$0xff] }
  0xa4   : > { %vm805_vm2 = vcmp.ge.f32.partialorder %v3255_v44, 0.0  ;;  %v769_v31 = vsel %vm2451_vm11, %v768_v18, %v764_v45  ;;  %v806_v42 = vmul.f32 %v3256_v26, %v2088_v11  ;;  %v807_v25 = vmul.f32 %v3257_v49, %v2106_v39  ;;  %v3266_v45 = vld [vmem:[#allocation47_spill] sm:$0xff]  ;;  %v3272_v26 = vld [vmem:[#allocation53_spill] sm:$0xff]  ;;  %v3273_v44 = vld [vmem:[#allocation54_spill] sm:$0xff] }
  0xa5   : > { %v808_v61 = vmul.f32 %v3258_v36, %v2136_v29  ;;  %v809_v24 = vmul.f32 %v3259_v20, %v2146_v55  ;;  %v810_v14 = vmul.f32 %v3260_v51, %v2151_v16  ;;  %v811_v43 = vmul.f32 %v3261_v62, %v2164_v9  ;;  %v3267_v62 = vld [vmem:[#allocation48_spill] sm:$0xff]  ;;  %v3302_v38 = vld [vmem:[#allocation34_spill] sm:$0xff] }
  0xa6   : > { %v812_v33 = vmul.f32 %v3262_v53, %v2168_v22  ;;  %v784_v32 = vsel %vm2465_vm12, %v783_v15, %v779_v58  ;;  %v813_v18 = vmul.f32 %v3263_v23, %v2214_v2  ;;  %v814_v47 = vmul.f32 %v3264_v52, %v2219_v1  ;;  %v3268_v53 = vld [vmem:[#allocation49_spill] sm:$0xff]  ;;  %v3270_v58 = vld [vmem:[#allocation51_spill] sm:$0xff]  ;;  %v3271_v52 = vld [vmem:[#allocation52_spill] sm:$0xff] }
  0xa7   : > { %v815_v27 = vmul.f32 %v3265_v34, %v2338_v46  ;;  %v816_v51 = vmul.f32 %v3266_v45, %v2352_v8  ;;  %v817_v20 = vmul.f32 %v3267_v62, %v2365_v4  ;;  %v818_v36 = vmul.f32 %v3268_v53, %v2369_v17  ;;  %v3274_v45 = vld [vmem:[#allocation55_spill] sm:$0xff]  ;;  %v3275_v56 = vld [vmem:[#allocation56_spill] sm:$0xff] }
  0xa8   : > { %v819_v15 = vmul.f32 %v3269_v59, %v2401_v63  ;;  %v820_v23 = vmul.f32 %v3270_v58, %v2408_v35  ;;  %v821_v49 = vmul.f32 %v3271_v52, %v2443_v37  ;;  %v822_v34 = vmul.f32 %v3272_v26, %v739_v57  ;;  %v870_v50 = vld [vmem:[%s2952_s3] sm:$0xff] }
  0xa9   : > { %v823_v48 = vmul.f32 %v3273_v44, %v754_v40  ;;  %v824_v21 = vmul.f32 %v3274_v45, %v769_v31  ;;  %v825_v62 = vmul.f32 %v3275_v56, %v784_v32  ;;  %v2552_v53 = vsel %vm786_vm9, %v2088_v11, %v806_v42  ;;  %v3316_v42 = vld [vmem:[#allocation42_spill] sm:$0xff] }
  0xaa   : > { %vm3276_vm6 = vcmp.ge.f32.partialorder %v1623_v5, 0.0  ;;  %vm3277_vm11 = vcmp.ge.f32.partialorder %v1626_v6, 0.0  ;;  %vm3278_vm12 = vcmp.ge.f32.partialorder %v1629_v7, 0.0  ;;  %v2572_v3 = vsel %vm790_vm7, %v2151_v16, %v810_v14 }
  0xab   : > { %v2557_v58 = vsel %vm3276_vm6, %v2106_v39, %v807_v25  ;;  %v2562_v26 = vsel %vm3277_vm11, %v2136_v29, %v808_v61  ;;  %v2567_v45 = vsel %vm3278_vm12, %v2146_v55, %v809_v24  ;;  %vm3279_vm9 = vcmp.ge.f32.partialorder %v1639_v13, 0.0  ;;  %v3320_v61 = vld [vmem:[#allocation25_spill] sm:$0xff]  ;;  %v3322_v24 = vld [vmem:[#allocation44_spill] sm:$0xff] }
  0xac   : > { %v2577_v5 = vsel %vm3279_vm9, %v2164_v9, %v811_v43  ;;  %v2582_v6 = vsel %vm792_vm8, %v2168_v22, %v812_v33  ;;  %vm3280_vm4 = vcmp.ge.f32.partialorder %v3243_v54, 0.0  ;;  %vm3282_vm7 = vcmp.ge.f32.partialorder %v3244_v41, 0.0  ;;  %v3305_v41 = vld [vmem:[#allocation17_spill] sm:$0xff]  ;;  %v3326_v43 = vld [vmem:[#allocation28_spill] sm:$0xff] }
  0xad   : > { %v2587_v7 = vsel %vm3280_vm4, %v2214_v2, %v813_v18  ;;  %v2592_v12 = vsel %vm3282_vm7, %v2219_v1, %v814_v47  ;;  %vm3284_vm6 = vcmp.ge.f32.partialorder %v3245_v19, 0.0  ;;  %v2602_v39 = vsel %vm796_vm13, %v2352_v8, %v816_v51  ;;  %v3323_v51 = vld [vmem:[#allocation26_spill] sm:$0xff]  ;;  %v2691_v47 = vld [vmem:[%s2952_s3 + $0x8] sm:$0x3] }
  0xae   : > { %3281 = vst [vmem:[#allocation13_spill] sm:$0xff] %v2587_v7  ;;  %v2597_v13 = vsel %vm3284_vm6, %v2338_v46, %v815_v27  ;;  %vm3287_vm8 = vcmp.ge.f32.partialorder %v3247_v0, 0.0  ;;  %vm3289_vm11 = vcmp.ge.f32.partialorder %v3248_v60, 0.0  ;;  %v2617_v16 = vsel %vm799_vm1, %v2401_v63, %v819_v15  ;;  %v3307_v0 = vld [vmem:[#allocation38_spill] sm:$0xff]  ;;  %v3308_v60 = vld [vmem:[#allocation19_spill] sm:$0xff] }
  0xaf   : > { %v875_v11 = vpop.permute.xlu0 %874  ;;  %3283 = vst [vmem:[#allocation14_spill] sm:$0xff] %v2592_v12  ;;  %v2607_v29 = vsel %vm3287_vm8, %v2365_v4, %v817_v20  ;;  %v2612_v55 = vsel %vm3289_vm11, %v2369_v17, %v818_v36  ;;  %v2622_v9 = vsel %vm800_vm3, %v2408_v35, %v820_v23  ;;  %v2627_v22 = vsel %vm801_vm5, %v2443_v37, %v821_v49  ;;  %v3317_v49 = vld [vmem:[#allocation23_spill] sm:$0xff]  ;;  %v3329_v23 = vld [vmem:[#allocation30_spill] sm:$0xff] }
  0xb0   : > { %3285 = vst [vmem:[#allocation15_spill] sm:$0xff] %v2597_v13  ;;  %v2631_v1 = vsel %vm802_vm15, %v739_v57, %v822_v34  ;;  %v2635_v8 = vsel %vm803_vm14, %v754_v40, %v823_v48  ;;  %v2639_v17 = vsel %vm804_vm10, %v769_v31, %v824_v21  ;;  %v2643_v35 = vsel %vm805_vm2, %v784_v32, %v825_v62  ;;  %v3304_v57 = vld [vmem:[#allocation36_spill] sm:$0xff]  ;;  %v3313_v21 = vld [vmem:[#allocation41_spill] sm:$0xff]  ;;  %v3314_v48 = vld [vmem:[#allocation22_spill] sm:$0xff] }
  0xb1   : > { %3286 = vst [vmem:[#allocation18_spill] sm:$0xff] %v2602_v39  ;;  %vm3306_vm3 = vnez %v3305_v41  ;;  %vm3309_vm5 = vnez %v3308_v60  ;;  %v3310_v40 = vld [vmem:[#allocation40_spill] sm:$0xff]  ;;  %vm3312_vm15 = vnez %v3311_v10  ;;  %vm3315_vm10 = vnez %v3314_v48  ;;  %v3319_v36 = vld [vmem:[#allocation43_spill] sm:$0xff] }
  0xb2   : > { %3288 = vst [vmem:[#allocation21_spill] sm:$0xff] %v2607_v29  ;;  %vm3318_vm13 = vnez %v3317_v49  ;;  %vm3321_vm2 = vnez %v3320_v61  ;;  %vm3324_vm1 = vnez %v3323_v51  ;;  %vm3327_vm14 = vnez %v3326_v43  ;;  %v2712_v4 = vld [vmem:[%s2951_s2] sm:$0xff] }
  0xb3   : > { %3290 = vst [vmem:[#allocation24_spill] sm:$0xff] %v2612_v55  ;;  %vm3330_vm12 = vnez %v3329_v23  ;;  %v884_v34 = vperm.slane %v870_v50, 0  ;;  %v885_v27 = vperm.slane %v870_v50, 1  ;;  %v886_v15 = vperm.slane %v870_v50, 2  ;;  %v3381_v51 = vld [vmem:[#allocation51_spill] sm:$0xff]  ;;  %v3387_v48 = vld [vmem:[#allocation52_spill] sm:$0xff] }
  0xb4   : > { %3291 = vst [vmem:[#allocation27_spill] sm:$0xff] %v2617_v16  ;;  %v887_v2 = vperm.slane %v870_v50, 3  ;;  %v888_v63 = vperm.slane %v870_v50, 4  ;;  %v889_v33 = vperm.slane %v870_v50, 5  ;;  %v890_v14 = vperm.slane %v870_v50, 6 }
  0xb5   : > { %3292 = vst [vmem:[#allocation29_spill] sm:$0xff] %v2622_v9  ;;  %v891_v28 = vperm.slane %v870_v50, 7  ;;  %v906_v16 = vmul.f32 %v886_v15, %v875_v11  ;;  %v926_v18 = vperm.slane %v2712_v4, 0  ;;  %v2730_v9 = vld [vmem:[%s2951_s2 + $0x8] sm:$0x3]  ;;  %v927_v54 = vperm.slane %v2712_v4, 1 }
  0xb6   : > { %3293 = vst [vmem:[#allocation31_spill] sm:$0xff] %v2627_v22  ;;  %v907_v50 = vmul.f32 %v887_v2, %v875_v11  ;;  %v908_v59 = vmul.f32 %v888_v63, %v875_v11  ;;  %v909_v44 = vmul.f32 %v889_v33, %v875_v11  ;;  %v928_v30 = vperm.slane %v2712_v4, 2 }
  0xb7   : > { %3295 = vst [vmem:[#allocation32_spill] sm:$0xff] %v2631_v1  ;;  %v2724_v56 = vpop.permute.xlu0 %879  ;;  %v911_v31 = vmul.f32 %v891_v28, %v875_v11  ;;  %v929_v22 = vperm.slane %v2712_v4, 3  ;;  %v3336_v52 = vperm.slane %v2691_v47, 0  ;;  %v3337_v55 = vperm.slane %v2691_v47, 1 }
  0xb8   : > { %3297 = vst [vmem:[#allocation33_spill] sm:$0xff] %v2635_v8  ;;  %v910_v8 = vmul.f32 %v890_v14, %v875_v11  ;;  %v914_v1 = vmul.f32 %v884_v34, %v2724_v56  ;;  %v930_v29 = vperm.slane %v2712_v4, 4  ;;  %v915_v20 = vmul.f32 %v885_v27, %v2724_v56 }
  0xb9   : > { %3299 = vst [vmem:[#allocation35_spill] sm:$0xff] %v2639_v17  ;;  %v905_v17 = vmul.f32 %v885_v27, %v875_v11  ;;  %v912_v19 = vmul.f32 %v3336_v52, %v875_v11  ;;  %v913_v25 = vmul.f32 %v3337_v55, %v875_v11  ;;  %v931_v39 = vperm.slane %v2712_v4, 5 }
  0xba   : > { %3301 = vst [vmem:[#allocation37_spill] sm:$0xff] %v2643_v35  ;;  %v904_v35 = vmul.f32 %v884_v34, %v875_v11  ;;  %v916_v32 = vmul.f32 %v886_v15, %v2724_v56  ;;  %v917_v11 = vmul.f32 %v887_v2, %v2724_v56  ;;  %v948_v34 = vadd.f32 %v928_v30, %v906_v16  ;;  %v2757_v2 = vld [vmem:[#allocation5] sm:$0xff] }
  0xbb   : > { %3331 = vst [vmem:[#allocation39_spill] sm:$0xff] %v2691_v47  ;;  %v947_v55 = vadd.f32 %v927_v54, %v905_v17  ;;  %v949_v12 = vadd.f32 %v929_v22, %v907_v50  ;;  %v918_v27 = vmul.f32 %v888_v63, %v2724_v56  ;;  %v919_v62 = vmul.f32 %v889_v33, %v2724_v56 }
  0xbc   : > { %v946_v47 = vadd.f32 %v926_v18, %v904_v35  ;;  %v920_v46 = vmul.f32 %v890_v14, %v2724_v56  ;;  %v950_v43 = vadd.f32 %v930_v29, %v908_v59  ;;  %v921_v13 = vmul.f32 %v891_v28, %v2724_v56 }
  0xbd   : > { %v951_v15 = vadd.f32 %v931_v39, %v909_v44  ;;  %v3338_v23 = vperm.slane %v2712_v4, 6  ;;  %v3339_v35 = vperm.slane %v2712_v4, 7  ;;  %v3340_v16 = vperm.slane %v2730_v9, 0 }
  0xbe   : > { %v3341_v63 = vperm.slane %v2730_v9, 1  ;;  %v956_v50 = vadd.f32 %v926_v18, %v914_v1  ;;  %v3342_v44 = vsel %vm1653_vm0, %v3302_v38, %v2552_v53  ;;  %v957_v28 = vadd.f32 %v927_v54, %v915_v20 }
  0xbf   : > { %v952_v7 = vadd.f32 %v3338_v23, %v910_v8  ;;  %v953_v52 = vadd.f32 %v3339_v35, %v911_v31  ;;  %v954_v17 = vadd.f32 %v3340_v16, %v912_v19  ;;  %v966_v59 = vadd.f32 %v946_v47, %v3342_v44 }
  0xc0   : > { %v955_v33 = vadd.f32 %v3341_v63, %v913_v25  ;;  %v3343_v8 = vsel %vm3306_vm3, %v3304_v57, %v2557_v58  ;;  %v3344_v19 = vsel %vm3309_vm5, %v3307_v0, %v2562_v26  ;;  %v3345_v1 = vsel %vm3312_vm15, %v3310_v40, %v2567_v45  ;;  %v2796_v45 = vld [vmem:[#allocation5 + $0x8] sm:$0x3]  ;;  %v3352_v63 = vld [vmem:[#allocation45_spill] sm:$0xff]  ;;  %v3384_v10 = vld [vmem:[#allocation35_spill] sm:$0xff] }
  0xc1   : > { %v967_v31 = vadd.f32 %v947_v55, %v3343_v8  ;;  %v968_v25 = vadd.f32 %v948_v34, %v3344_v19  ;;  %v969_v53 = vadd.f32 %v949_v12, %v3345_v1  ;;  %v3346_v38 = vsel %vm3315_vm10, %v3313_v21, %v2572_v3 }
  0xc2   : > { %v970_v54 = vadd.f32 %v950_v43, %v3346_v38  ;;  %v990_v58 = vperm.slane %v2757_v2, 0  ;;  %v991_v57 = vperm.slane %v2757_v2, 1  ;;  %v992_v20 = vperm.slane %v2757_v2, 2 }
  0xc3   : > { %v3347_v26 = vsel %vm3318_vm13, %v3316_v42, %v2577_v5  ;;  %v993_v12 = vperm.slane %v2757_v2, 3  ;;  %v994_v3 = vperm.slane %v2757_v2, 4  ;;  %v995_v40 = vperm.slane %v2757_v2, 5  ;;  %v3349_v5 = vld [vmem:[#allocation13_spill] sm:$0xff] }
  0xc4   : > { %v971_v0 = vadd.f32 %v951_v15, %v3347_v26  ;;  %v3348_v21 = vsel %vm3321_vm2, %v3319_v36, %v2582_v6  ;;  %v3350_v42 = vsel %vm3324_vm1, %v3322_v24, %v3349_v5  ;;  %v996_v23 = vperm.slane %v2757_v2, 6  ;;  %v3353_v6 = vld [vmem:[#allocation14_spill] sm:$0xff]  ;;  %v3365_v5 = vld [vmem:[#allocation48_spill] sm:$0xff] }
  0xc5   : > { %v972_v14 = vadd.f32 %v952_v7, %v3348_v21  ;;  %v973_v43 = vadd.f32 %v953_v52, %v3350_v42  ;;  %v1010_v18 = vmul.f32 %v990_v58, %v966_v59  ;;  %v997_v47 = vperm.slane %v2757_v2, 7  ;;  %v3366_v42 = vld [vmem:[#allocation21_spill] sm:$0xff] }
  0xc6   : > { %v1011_v55 = vmul.f32 %v991_v57, %v967_v31  ;;  %v1012_v34 = vmul.f32 %v992_v20, %v968_v25  ;;  %v1013_v15 = vmul.f32 %v993_v12, %v969_v53  ;;  %v958_v35 = vadd.f32 %v928_v30, %v916_v32  ;;  %v3356_v30 = vld [vmem:[#allocation46_spill] sm:$0xff]  ;;  %v3357_v32 = vld [vmem:[#allocation15_spill] sm:$0xff] }
  0xc7   : > { %v3354_v7 = vsel %vm3327_vm14, %v3352_v63, %v3353_v6  ;;  %v998_v44 = vperm.slane %v2796_v45, 0  ;;  %v1014_v8 = vmul.f32 %v994_v3, %v970_v54  ;;  %1030 = vst [vmem:[%s2821_s11] sm:$0xff] %v1010_v18  ;;  %v959_v24 = vadd.f32 %v929_v22, %v917_v11  ;;  %v3359_v25 = vld [vmem:[#allocation39_spill] sm:$0xff]  ;;  %v3362_v11 = vld [vmem:[#allocation18_spill] sm:$0xff] }
  0xc8   : > { %v974_v36 = vadd.f32 %v954_v17, %v3354_v7  ;;  %v3358_v59 = vsel %vm3330_vm12, %v3356_v30, %v3357_v32  ;;  %v999_v17 = vperm.slane %v2796_v45, 1  ;;  %v1015_v19 = vmul.f32 %v995_v40, %v971_v0  ;;  %1031 = vst [vmem:[%s2821_s11 + $0x8] sm:$0xff] %v1011_v55  ;;  %v3361_v22 = vld [vmem:[#allocation47_spill] sm:$0xff]  ;;  %v3369_v55 = vld [vmem:[#allocation53_spill] sm:$0xff] }
  0xc9   : > { %v975_v31 = vadd.f32 %v955_v33, %v3358_v59  ;;  %v3360_v1 = vperm.slane %v3359_v25, 0  ;;  %v960_v38 = vadd.f32 %v930_v29, %v918_v27  ;;  %v3363_v54 = vsel %vm1653_vm0, %v3361_v22, %v3362_v11  ;;  %1032 = vst [vmem:[%s2821_s11 + $0x10] sm:$0xff] %v1012_v34  ;;  %v3368_v27 = vld [vmem:[#allocation32_spill] sm:$0xff]  ;;  %v3378_v7 = vld [vmem:[#allocation27_spill] sm:$0xff]  ;;  %v3390_v22 = vld [vmem:[#allocation37_spill] sm:$0xff] }
  0xca   : > { %v976_v26 = vadd.f32 %v956_v50, %v3363_v54  ;;  %v1016_v21 = vmul.f32 %v996_v23, %v972_v14  ;;  %v3364_v33 = vperm.slane %v3359_v25, 1  ;;  %v961_v45 = vadd.f32 %v931_v39, %v919_v62  ;;  %1033 = vst [vmem:[%s2821_s11 + $0x18] sm:$0xff] %v1013_v15  ;;  %v3372_v39 = vld [vmem:[#allocation24_spill] sm:$0xff] }
  0xcb   : > { %v922_v53 = vmul.f32 %v3360_v1, %v2724_v56  ;;  %v3367_v18 = vsel %vm3306_vm3, %v3365_v5, %v3366_v42  ;;  %v1017_v37 = vmul.f32 %v997_v47, %v973_v43  ;;  %v862_v50 = vsel %vm3321_vm2, %v3369_v55, %v3368_v27  ;;  %1034 = vst [vmem:[%s2821_s11 + $0x20] sm:$0xff] %v1014_v8  ;;  %v3375_v43 = vld [vmem:[#allocation54_spill] sm:$0xff]  ;;  %v3382_v8 = vld [vmem:[#allocation29_spill] sm:$0xff]  ;;  %v3388_v1 = vld [vmem:[#allocation31_spill] sm:$0xff] }
  0xcc   : > { %v923_v0 = vmul.f32 %v3364_v33, %v2724_v56  ;;  %v977_v29 = vadd.f32 %v957_v28, %v3367_v18  ;;  %v3370_v14 = vperm.slane %v2712_v4, 6  ;;  %v3371_v56 = vld [vmem:[#allocation49_spill] sm:$0xff]  ;;  %v1018_v63 = vmul.f32 %v998_v44, %v974_v36  ;;  %1035 = vst [vmem:[%s2821_s11 + $0x28] sm:$0xff] %v1015_v19  ;;  %v3391_v11 = vld [vmem:[#allocation56_spill] sm:$0xff] }
  0xcd   : > { %v3373_v41 = vsel %vm3309_vm5, %v3371_v56, %v3372_v39  ;;  %v3374_v28 = vld [vmem:[#allocation33_spill] sm:$0xff]  ;;  %v3376_v61 = vperm.slane %v2712_v4, 7  ;;  %v1019_v32 = vmul.f32 %v999_v17, %v975_v31  ;;  %v3383_v59 = vsel %vm3315_vm10, %v3381_v51, %v3382_v8  ;;  %1036 = vst [vmem:[%s2821_s11 + $0x30] sm:$0xff] %v1016_v21  ;;  %v3385_v4 = vld [vmem:[#allocation55_spill] sm:$0xff] }
  0xce   : > { %v962_v34 = vadd.f32 %v3370_v14, %v920_v46  ;;  %v978_v62 = vadd.f32 %v958_v35, %v3373_v41  ;;  %v863_v15 = vsel %vm3324_vm1, %v3375_v43, %v3374_v28  ;;  %v3377_v46 = vld [vmem:[#allocation50_spill] sm:$0xff]  ;;  %v3380_v35 = vperm.slane %v2730_v9, 0  ;;  %1037 = vst [vmem:[%s2821_s11 + $0x38] sm:$0xff] %v1017_v37 }
  0xcf   : > { %v963_v6 = vadd.f32 %v3376_v61, %v921_v13  ;;  %v3379_v60 = vsel %vm3312_vm15, %v3377_v46, %v3378_v7  ;;  %v980_v25 = vadd.f32 %v960_v38, %v3383_v59  ;;  %v1020_v13 = vmul.f32 %v990_v58, %v976_v26  ;;  %1038 = vst [vmem:[%s2821_s11 + $0x40] sm:$0xff] %v1018_v63 }
  0xd0   : > { %v979_v30 = vadd.f32 %v959_v24, %v3379_v60  ;;  %v964_v36 = vadd.f32 %v3380_v35, %v922_v53  ;;  %vm1039_vm0 = vcmask 392192   ;;  %v864_v24 = vsel %vm3327_vm14, %v3385_v4, %v3384_v10 }
  0xd1   : > { %v3386_v31 = vperm.slane %v2730_v9, 1  ;;  %v3389_v53 = vsel %vm3318_vm13, %v3387_v48, %v3388_v1  ;;  %v1021_v58 = vmul.f32 %v991_v57, %v977_v29  ;;  %v865_v54 = vsel %vm3330_vm12, %v3391_v11, %v3390_v22  ;;  %1040 = vst.msk [vmem:[%s2821_s11 + $0x48] sm:$0xff] %vm1039_vm0, %v1019_v32 }
  0xd2   : > { %v981_v38 = vadd.f32 %v961_v45, %v3389_v53  ;;  %v982_v16 = vadd.f32 %v962_v34, %v862_v50  ;;  %v1022_v26 = vmul.f32 %v992_v20, %v978_v62  ;;  %v983_v9 = vadd.f32 %v963_v6, %v863_v15  ;;  %1041 = vst [vmem:[%s2821_s11 + $0x50] sm:$0xff] %v1020_v13 }
  0xd3   : > { %v965_v19 = vadd.f32 %v3386_v31, %v923_v0  ;;  %v1023_v49 = vmul.f32 %v993_v12, %v979_v30  ;;  %v984_v21 = vadd.f32 %v964_v36, %v864_v24  ;;  %v1024_v57 = vmul.f32 %v994_v3, %v980_v25  ;;  %1042 = vst [vmem:[%s2821_s11 + $0x58] sm:$0xff] %v1021_v58 }
  0xd4   : > { %v1025_v20 = vmul.f32 %v995_v40, %v981_v38  ;;  %v1026_v12 = vmul.f32 %v996_v23, %v982_v16  ;;  %1043 = vst [vmem:[%s2821_s11 + $0x60] sm:$0xff] %v1022_v26  ;;  %v1027_v33 = vmul.f32 %v997_v47, %v983_v9 }
  0xd5   : > { %v985_v52 = vadd.f32 %v965_v19, %v865_v54  ;;  %1044 = vst [vmem:[%s2821_s11 + $0x68] sm:$0xff] %v1023_v49  ;;  %v1028_v3 = vmul.f32 %v998_v44, %v984_v21 }
  0xd6   : > { %1045 = vst [vmem:[%s2821_s11 + $0x70] sm:$0xff] %v1024_v57 }
  0xd7   : > { %v1029_v0 = vmul.f32 %v999_v17, %v985_v52  ;;  %1046 = vst [vmem:[%s2821_s11 + $0x78] sm:$0xff] %v1025_v20 }
  0xd8   : > { %1047 = vst [vmem:[%s2821_s11 + $0x80] sm:$0xff] %v1026_v12 }
  0xd9   : > { %1048 = vst [vmem:[%s2821_s11 + $0x88] sm:$0xff] %v1027_v33 }
  0xda   : > { %1049 = vst [vmem:[%s2821_s11 + $0x90] sm:$0xff] %v1028_v3 }
  0xdb   : > { %1050 = vst.msk [vmem:[%s2821_s11 + $0x98] sm:$0xff] %vm1039_vm0, %v1029_v0 }
  0xdc   : > { %1413 = shalt.err (!%p1410_p9)
}
  0xdd   : > { %s1462_s28 = smov 1280   ;;  %s1463_s23 = smov 80  }
  0xde   : > { %1189 = dma.vmem_to_hbm [thread:$0]  (%p1551_p11), %s1066_s12, 2560, %s1068_s13, %s1052_s15, %s1462_s28, %s1462_s28, %s1463_s23  }
  0xdf PF: > { %s1082_s29 = sand.u32 1, %s1444_s21   ;;  %p3392_p10 = scmp.ge.s32.totalorder %s1456_s24, 2 }
  0xe0   : > { %s1083_s5 = scalar_lea.sflag [#allocation4], %s1082_s29 }
  0xe1   : > { %p1200_p1 = pnand %p3392_p10, %p1555_p12 }
  0xe3   : > { %p1201_p2 = pneg %p1200_p1 }
  0xe5   : > { %1439 = dma.done.wait (%p1201_p2), %s1083_s5, 2560  }
  0xe6   : > { %1441 = vsyncadd (%p1201_p2), %s1083_s5, 4294964736  ;;  %s3393_s11 = sld [smem:[#allocation11_spill]]  ;;  %p20_p3 = scmp.ge.s32.totalorder %s1524_s27, 4  }
  0xe7   : > { %s3394_s23 = sld [smem:[#allocation12_spill]]  ;;  %s3395_s21 = smov %s1448_s22 }
  0xe8   : > { %s3397_s24 = smov %s1524_s27  ;;  %22 = sbr.rel (!%p20_p3) target bundleno = 8 (0x8), region = 96 }
  0xec   : > { %s3396_s22 = smov %s3393_s11 }
  0xed   :  { %1089 = vsyncpa [#allocation3], 1 }
  0xee   :  { %1091 = vsyncpa [#allocation3 + $0x1], 1 }
  0xef   :  { %1092 = vsyncpa [#allocation6], 1 }
  0xf0   :  { %1093 = vsyncpa [#allocation4], 1 }
  0xf1   :  { %1095 = vsyncpa [#allocation4 + $0x1], 1 }

</bundles_post_ra>
